<compile_context>
chip_gen: v5e
topology: v5e:2x2
jax: 0.10.0
libtpu: 0.0.40
codegen_flags: <defaults>
</compile_context>

<pallas_src>
import functools

import jax
import jax.numpy as jnp
from jax.experimental import pallas as pl
from jax.experimental.pallas import tpu as pltpu

_LANE = 128        # TPU vreg lane width; batch tiles are multiples of this
_NUM_CORES = 2     # v7x has 2 TensorCores; harmless over-splitting on v5e/v6e
_HIGH = jax.lax.Precision.HIGHEST


def _round_up(n, m):
    return ((n + m - 1) // m) * m


# ---------------------------------------------------------------------------
# Kernel (feature-major: activations are [features, batch_tile])
# ---------------------------------------------------------------------------
def make_a2c_kernel(h2, col_b2, col_b3):
    """Fused critic||actor MLP. Closes over static column offsets."""

    def kernel(x_ref, wcol_ref, wrow_ref, out_ref):
        x = x_ref[...]                      # [k1, tb]  (row state_dim = ones)
        wcol = wcol_ref[...]                # [h2, k1]  layer-1 W^T + bias cols

        # Layer 1 on the MXU (K = k1 = 8). b1 enters via the ones-row of x;
        # the b2/b3 columns of wcol meet zero input rows -> no contribution.
        h = jnp.tanh(jnp.dot(wcol, x, precision=_HIGH,
                             preferred_element_type=jnp.float32))   # [h2, tb]

        # Layer 2: block-diagonal fused [128,128] MXU matmul; bias is a
        # [h2, 1] column broadcast along lanes (softmax-style broadcast).
        w2t = wrow_ref[0:h2, :]                                      # [h2, h2]
        b2c = wcol[:, col_b2:col_b2 + 1]                             # [h2, 1]
        h = jnp.tanh(jnp.dot(w2t, h, precision=_HIGH,
                             preferred_element_type=jnp.float32) + b2c)

        # Layer 3: [8,128] @ [128,tb] -> [8,tb]; row 0 = value, row 1 = mean.
        w3s = wrow_ref[h2:h2 + 8, :]                                 # [8, h2]
        b3c = wcol[0:8, col_b3:col_b3 + 1]                           # [8, 1]
        out_ref[...] = jnp.dot(w3s, h, precision=_HIGH,
                               preferred_element_type=jnp.float32) + b3c

    return kernel


# ---------------------------------------------------------------------------
# Host-side parameter packing (done once)
# ---------------------------------------------------------------------------
def pack_params(critic_params, actor_params, state_dim, hidden=64):
    """Pack both MLPs into two feature-major f32 arrays.

    wcol: [2*hidden, k1]  cols 0..state_dim-1 = fused W1^T,
                          col state_dim   = fused b1 (pairs with the ones-row),
                          col state_dim+1 = fused b2 column,
                          col state_dim+2 = b3 column (rows 0..1), rest zero.
    wrow: [2*hidden + 8, 2*hidden]  rows 0..127 = fused block-diag W2^T,
                          row 128 = critic W3^T, row 129 = actor W3^T, rest 0.
    """
    h2 = 2 * hidden
    cw1, cb1, cw2, cb2, cw3, cb3 = critic_params
    aw1, ab1, aw2, ab2, aw3, ab3 = actor_params

    w1 = jnp.concatenate([cw1, aw1], axis=1)              # [state_dim, 128]
    b1 = jnp.concatenate([cb1, ab1], axis=1)              # [1, 128]
    w2 = jnp.zeros((h2, h2), jnp.float32)
    w2 = w2.at[:hidden, :hidden].set(cw2).at[hidden:, hidden:].set(aw2)
    b2 = jnp.concatenate([cb2, ab2], axis=1)              # [1, 128]

    k1 = _round_up(state_dim + 3, 8)          # input rows: features+ones+pad
    col_b1, col_b2, col_b3 = state_dim, state_dim + 1, state_dim + 2

    wcol = jnp.zeros((h2, k1), jnp.float32)
    wcol = wcol.at[:, :state_dim].set(w1.T)
    wcol = wcol.at[:, col_b1].set(b1[0])
    wcol = wcol.at[:, col_b2].set(b2[0])
    wcol = wcol.at[0, col_b3].set(cb3[0, 0])
    wcol = wcol.at[1, col_b3].set(ab3[0, 0])

    wrow = jnp.zeros((h2 + 8, h2), jnp.float32)
    wrow = wrow.at[:h2, :].set(w2.T)
    wrow = wrow.at[h2 + 0, :hidden].set(cw3[:, 0])
    wrow = wrow.at[h2 + 1, hidden:].set(aw3[:, 0])
    return wcol, wrow


# ---------------------------------------------------------------------------
# Wrapper
# ---------------------------------------------------------------------------
@functools.partial(jax.jit, static_argnames=("block_rows",))
def _a2c_forward_impl(state, wcol, wrow, *, block_rows):
    B, state_dim = state.shape
    h2 = wrow.shape[1]
    k1 = wcol.shape[1]

    # --- tile sizing: >= _NUM_CORES grid steps whenever the batch allows ----
    bp_min = _round_up(B, _LANE)
    tb = min(_round_up(block_rows, _LANE),
             max(_LANE, _round_up(pl.cdiv(bp_min, _NUM_CORES), _LANE)))
    bp = _round_up(B, tb)
    grid = (bp // tb,)

    # --- feature-major input: [k1, bp]; row `state_dim` = ones (b1 fold) ----
    xt = jnp.concatenate([state.T, jnp.ones((1, B), jnp.float32)], axis=0)
    xt = jnp.pad(xt, ((0, k1 - state_dim - 1), (0, bp - B)))

    out = pl.pallas_call(
        make_a2c_kernel(h2, col_b2=state_dim + 1, col_b3=state_dim + 2),
        out_shape=jax.ShapeDtypeStruct((8, bp), jnp.float32),
        grid=grid,
        in_specs=[
            pl.BlockSpec((k1, tb), lambda i: (0, i)),
            # Resident params: whole array in VMEM, not pipelined (no
            # double-buffering, copied in once before the grid runs).
            pl.BlockSpec(memory_space=pltpu.MemorySpace.VMEM),
            pl.BlockSpec(memory_space=pltpu.MemorySpace.VMEM),
        ],
        out_specs=pl.BlockSpec((8, tb), lambda i: (0, i)),
        compiler_params=pltpu.CompilerParams(
            dimension_semantics=("parallel",)),   # shard batch across TCs
    )(xt, wcol, wrow)
    return out                                    # [8, bp]


def a2c_forward(state, wcol, wrow, log_std, *, block_rows=2048):
    """state: [state_dim] or [B, state_dim] f32.
    Returns (state_values, action_mean, exp(log_std)) matching the torch
    module's forward()."""
    squeeze = state.ndim == 1
    if squeeze:
        state = state[None, :]
    B = state.shape[0]

    out = _a2c_forward_impl(state, wcol, wrow, block_rows=int(block_rows))
    vm = out[:2, :B]                 # one narrow slice of the output slab
    values = vm[0:1, :].T            # [B, 1]
    mean = vm[1:2, :].T              # [B, 1]
    std = jnp.exp(log_std)           # single scalar: plain JAX

    if squeeze:                      # single-state call -> shape [1] outputs
        values, mean = values[0], mean[0]
    return values, mean, std


# ---------------------------------------------------------------------------
# Init + reference
# ---------------------------------------------------------------------------
def init_linear(key, fan_in, fan_out):
    """PyTorch-Linear-style init; weight returned as [in, out]."""
    kw, kb = jax.random.split(key)
    bound = 1.0 / jnp.sqrt(jnp.float32(fan_in))
    w = jax.random.uniform(kw, (fan_in, fan_out), jnp.float32, -bound, bound)
    b = jax.random.uniform(kb, (1, fan_out), jnp.float32, -bound, bound)
    return w, b


def init_mlp(key, state_dim, hidden=64):
    k1, k2, k3 = jax.random.split(key, 3)
    w1, b1 = init_linear(k1, state_dim, hidden)
    w2, b2 = init_linear(k2, hidden, hidden)
    w3, b3 = init_linear(k3, hidden, 1)
    return (w1, b1, w2, b2, w3, b3)


def reference_forward(state, critic_params, actor_params, log_std):
    def mlp(p):
        w1, b1, w2, b2, w3, b3 = p
        h = jnp.tanh(jnp.dot(state, w1, precision=_HIGH) + b1)
        h = jnp.tanh(jnp.dot(h, w2, precision=_HIGH) + b2)
        return jnp.dot(h, w3, precision=_HIGH) + b3
    return mlp(critic_params), mlp(actor_params), jnp.exp(log_std)


if __name__ == "__main__":
    key = jax.random.PRNGKey(0)
    k_state, k_critic, k_actor, k_big = jax.random.split(key, 4)

    state_dim, hidden = 4, 64   # CartPole-like continuous state

    critic_params = init_mlp(k_critic, state_dim, hidden)
    actor_params = init_mlp(k_actor, state_dim, hidden)
    log_std = jnp.zeros((1,), jnp.float32)   # nn.Parameter(torch.zeros(1))

    wcol, wrow = pack_params(critic_params, actor_params, state_dim, hidden)

    # --- single state: matches the torch forward() contract (shape [1]) -----
    s = jax.random.normal(k_state, (state_dim,), jnp.float32)
    v, m, std = a2c_forward(s, wcol, wrow, log_std)
    jax.block_until_ready((v, m, std))
    rv, rm, rs = reference_forward(s[None, :], critic_params, actor_params,
                                   log_std)
    assert v.shape == (1,) and m.shape == (1,)
    assert jnp.allclose(v, rv[0], atol=1e-5, rtol=1e-5)
    assert jnp.allclose(m, rm[0], atol=1e-5, rtol=1e-5)
    assert jnp.allclose(std, rs, atol=1e-6)

    # --- small batch (single grid step) --------------------------------------
    bstate = jax.random.normal(k_big, (8, state_dim), jnp.float32)
    bv, bm, bs = a2c_forward(bstate, wcol, wrow, log_std)
    jax.block_until_ready((bv, bm, bs))
    rbv, rbm, rbs = reference_forward(bstate, critic_params, actor_params,
                                      log_std)
    assert jnp.allclose(bv, rbv, atol=1e-5, rtol=1e-5)
    assert jnp.allclose(bm, rbm, atol=1e-5, rtol=1e-5)

    # --- larger ragged batch: 2-step "parallel" grid + batch padding ---------
    big = jax.random.normal(jax.random.fold_in(k_big, 1), (200, state_dim),
                            jnp.float32)
    gv, gm, gs = a2c_forward(big, wcol, wrow, log_std, block_rows=2048)
    jax.block_until_ready((gv, gm, gs))
    rgv, rgm, rgs = reference_forward(big, critic_params, actor_params,
                                      log_std)
    assert gv.shape == (200, 1) and gm.shape == (200, 1)
    assert jnp.allclose(gv, rgv, atol=1e-5, rtol=1e-5)
    assert jnp.allclose(gm, rgm, atol=1e-5, rtol=1e-5)
    assert jnp.allclose(gs, rgs, atol=1e-6)

    # TODO(synk): select_action's Normal sampling/clamp and get_losses'
    # per-env ragged Q-value recursion + Adam updates are host/training logic,
    # not part of the module's forward(), and are left out of the kernel.
    print("KERNEL_OK")
</pallas_src>

<mosaic_0001>
module attributes {stable_mosaic.version = 11 : i64} {
  func.func @kernel(%arg0: i32, %arg1: memref<8x128xf32, #tpu.memory_space<vmem>>, %arg2: memref<128x8xf32, #tpu.memory_space<vmem>>, %arg3: memref<136x128xf32, #tpu.memory_space<vmem>>, %arg4: memref<8x128xf32, #tpu.memory_space<vmem>>) attributes {dimension_semantics = [#tpu.dimension_semantics<parallel>], iteration_bounds = array<i64: 1>, scalar_prefetch = 0 : i64, scratch_operands = 0 : i64, tpu.core_type = #tpu.core_type<tc>, window_params = [{transform_indices = @transform_0, window_bounds = array<i64: 8, 128>}, {pipeline_mode = #tpu.pipeline_mode<synchronous>, transform_indices = @transform_1, window_bounds = array<i64: 128, 8>}, {pipeline_mode = #tpu.pipeline_mode<synchronous>, transform_indices = @transform_2, window_bounds = array<i64: 136, 128>}, {transform_indices = @transform_3, window_bounds = array<i64: 8, 128>}]} {
    %c0 = arith.constant 0 : index
    %c0_0 = arith.constant 0 : index
    %0 = vector.load %arg1[%c0, %c0_0] : memref<8x128xf32, #tpu.memory_space<vmem>>, vector<8x128xf32>
    %c0_1 = arith.constant 0 : index
    %c0_2 = arith.constant 0 : index
    %1 = vector.load %arg2[%c0_1, %c0_2] : memref<128x8xf32, #tpu.memory_space<vmem>>, vector<128x8xf32>
    %cst = arith.constant dense<0.000000e+00> : vector<128x128xf32>
    %2 = tpu.matmul %1, %0, %cst {dimension_numbers = #tpu.dot_dimension_numbers<[1], [0], [0], [1], [0, 0, 1, 1], [], []>, precision = #tpu.contract_precision<fp32>} : vector<128x8xf32>, vector<8x128xf32>, vector<128x128xf32> -> vector<128x128xf32>
    %3 = math.tanh %2 : vector<128x128xf32>
    %c0_3 = arith.constant 0 : index
    %c0_4 = arith.constant 0 : index
    %4 = vector.load %arg3[%c0_3, %c0_4] : memref<136x128xf32, #tpu.memory_space<vmem>>, vector<128x128xf32>
    %5 = vector.extract_strided_slice %1 {offsets = [0, 5], sizes = [128, 1], strides = [1, 1]} : vector<128x8xf32> to vector<128x1xf32>
    %cst_5 = arith.constant dense<0.000000e+00> : vector<128x128xf32>
    %6 = tpu.matmul %4, %3, %cst_5 {dimension_numbers = #tpu.dot_dimension_numbers<[1], [0], [0], [1], [0, 0, 1, 1], [], []>, precision = #tpu.contract_precision<fp32>} : vector<128x128xf32>, vector<128x128xf32>, vector<128x128xf32> -> vector<128x128xf32>
    %7 = vector.broadcast %5 : vector<128x1xf32> to vector<128x128xf32>
    %8 = arith.addf %6, %7 : vector<128x128xf32>
    %9 = math.tanh %8 : vector<128x128xf32>
    %c128 = arith.constant 128 : index
    %c0_6 = arith.constant 0 : index
    %10 = vector.load %arg3[%c128, %c0_6] : memref<136x128xf32, #tpu.memory_space<vmem>>, vector<8x128xf32>
    %11 = vector.extract_strided_slice %1 {offsets = [0, 6], sizes = [8, 1], strides = [1, 1]} : vector<128x8xf32> to vector<8x1xf32>
    %cst_7 = arith.constant dense<0.000000e+00> : vector<8x128xf32>
    %12 = tpu.matmul %10, %9, %cst_7 {dimension_numbers = #tpu.dot_dimension_numbers<[1], [0], [0], [1], [0, 0, 1, 1], [], []>, precision = #tpu.contract_precision<fp32>} : vector<8x128xf32>, vector<128x128xf32>, vector<8x128xf32> -> vector<8x128xf32>
    %13 = vector.broadcast %11 : vector<8x1xf32> to vector<8x128xf32>
    %14 = arith.addf %12, %13 : vector<8x128xf32>
    %c0_8 = arith.constant 0 : index
    %c0_9 = arith.constant 0 : index
    %15 = vector.load %arg4[%c0_8, %c0_9] : memref<8x128xf32, #tpu.memory_space<vmem>>, vector<8x128xf32>
    tpu.vector_store %arg4[%c0_8, %c0_9], %14 {strides = array<i32>} : memref<8x128xf32, #tpu.memory_space<vmem>>, vector<8x128xf32>,
    return
  }
  func.func @transform_0(%arg0: i32) -> (i32, i32) {
    %c0_i32 = arith.constant 0 : i32
    %c0_i32_0 = arith.constant 0 : i32
    return %c0_i32, %arg0 : i32, i32
  }
  func.func @transform_1(%arg0: i32) -> (i32, i32) {
    %c0_i32 = arith.constant 0 : i32
    %c0_i32_0 = arith.constant 0 : i32
    %c0_i32_1 = arith.constant 0 : i32
    return %c0_i32, %c0_i32_0 : i32, i32
  }
  func.func @transform_2(%arg0: i32) -> (i32, i32) {
    %c0_i32 = arith.constant 0 : i32
    %c0_i32_0 = arith.constant 0 : i32
    %c0_i32_1 = arith.constant 0 : i32
    return %c0_i32, %c0_i32_0 : i32, i32
  }
  func.func @transform_3(%arg0: i32) -> (i32, i32) {
    %c0_i32 = arith.constant 0 : i32
    %c0_i32_0 = arith.constant 0 : i32
    return %c0_i32, %arg0 : i32, i32
  }
}

</mosaic_0001>

<bundles_post_ra>
// kernel: _a2c_forward_impl.1
= control target key start
LH: loop header
LB: loop body
LE: loop exit
PB: predicated region body
PF: predicated region fallthrough
CT: control target
= control target key end

     0   :  { %vm32_vm0 = vcmask 64512   ;;  %s3290_s0 = inlined_call_operand.vmem [shape: f32[8,128], index: 0, kind: input, shape index: {}]   ;;  %s3291_s1 = inlined_call_operand.vmem [shape: f32[128,8], index: 1, kind: input, shape index: {}]   ;;  %s3292_s2 = inlined_call_operand.vmem [shape: f32[136,128], index: 2, kind: input, shape index: {}]   ;;  %s3293_s3 = inlined_call_operand.hbm [shape: f32[8,128], index: 3, kind: output, shape index: {}]  }
   0x1   :  { %v15_v0 = vld [vmem:[%s3290_s0] sm:$0xff]  ;;  %v2112_v2 = vld [vmem:[%s3291_s1 + $0x70] sm:$0xff]  ;;  %v17_v6 = vld [vmem:[%s3291_s1 + $0x8] sm:$0xff] }
   0x2   :  { %v16_v1 = vld [vmem:[%s3291_s1] sm:$0xff]  ;;  %3302 = vst [vmem:[#allocation5_spill] sm:$0xff] %v2112_v2  ;;  %v96_v3 = vand.u32 4294901760, %v15_v0  ;;  %v76_v5 = vsel %vm32_vm0, %v2112_v2, 0  ;;  %v2123_v7 = vld [vmem:[%s3291_s1 + $0x78] sm:$0xff]  ;;  %v18_v8 = vld [vmem:[%s3291_s1 + $0x10] sm:$0xff] }
   0x3   :  { %v34_v4 = vsel %vm32_vm0, %v16_v1, 0  ;;  %v2130_v10 = vand.u32 4294901760, %v76_v5  ;;  %v37_v11 = vsel %vm32_vm0, %v17_v6, 0  ;;  %v79_v12 = vsel %vm32_vm0, %v2123_v7, 0 }
   0x4   :  { %v2128_v9 = vand.u32 4294901760, %v34_v4  ;;  %97 = vmatpush.msra.mxu0 %v96_v3  ;;  %1973 = vmatpush.msra.mxu2 %v96_v3  ;;  %v243_v13 = vsub.f32 %v15_v0, %v96_v3  ;;  %v2135_v14 = vand.u32 4294901760, %v37_v11  ;;  %v2137_v15 = vand.u32 4294901760, %v79_v12 }
   0x5   :  { %8 = vsyncpa [#allocation3], 0  ;;  %v2141_v17 = vsub.f32 %v76_v5, %v2130_v10  ;;  %v40_v18 = vsel %vm32_vm0, %v18_v8, 0  ;;  %v19_v33 = vld [vmem:[%s3291_s1 + $0x18] sm:$0xff]  ;;  %v20_v42 = vld [vmem:[%s3291_s1 + $0x20] sm:$0xff]  ;;  %s1964_s12 = sshll.u32 %s3293_s3, 4  ;;  %s1965_s12 = int_to_ptr.hbm [resolvable:$true] %s1964_s12 }
   0x6   :  { %v99_v16 = vsub.f32 %v34_v4, %v2128_v9  ;;  %v244_v19 = vand.u32 4294901760, %v243_v13  ;;  %v107_v20 = vsub.f32 %v37_v11, %v2135_v14  ;;  %v2146_v21 = vsub.f32 %v79_v12, %v2137_v15  ;;  %330 = vmatpush.msrb.mxu2 %v243_v13  ;;  %v21_v49 = vld [vmem:[%s3291_s1 + $0x28] sm:$0xff]  ;;  %v2187_v56 = vld [vmem:[%s3291_s1 + $0x30] sm:$0xff]  ;;  %v2198_v63 = vld [vmem:[%s3291_s1 + $0x38] sm:$0xff] }
   0x7   :  { %v212_v23 = vand.u32 4294901760, %v2141_v17  ;;  %v2149_v25 = vand.u32 4294901760, %v40_v18  ;;  %v43_v37 = vsel %vm32_vm0, %v19_v33, 0  ;;  %v46_v45 = vsel %vm32_vm0, %v20_v42, 0  ;;  %3303 = vst [vmem:[#allocation6_spill] sm:$0xff] %v2187_v56  ;;  %v2209_v8 = vld [vmem:[%s3291_s1 + $0x40] sm:$0xff] }
   0x8   :  { %v100_v22 = vand.u32 4294901760, %v99_v16  ;;  %v245_v24 = vsub.f32 %v243_v13, %v244_v19  ;;  %544 = vmatpush.msrb.mxu0 %v244_v19  ;;  %v108_v28 = vand.u32 4294901760, %v107_v20  ;;  %v220_v29 = vand.u32 4294901760, %v2146_v21  ;;  %3304 = vst [vmem:[#allocation7_spill] sm:$0xff] %v2198_v63 }
   0x9   :  { %v213_v27 = vsub.f32 %v2141_v17, %v212_v23  ;;  %v115_v36 = vsub.f32 %v40_v18, %v2149_v25  ;;  %v2165_v41 = vand.u32 4294901760, %v43_v37  ;;  %v2174_v48 = vand.u32 4294901760, %v46_v45  ;;  %3305 = vst [vmem:[#allocation8_spill] sm:$0xff] %v2209_v8 }
   0xa   :  { %v101_v26 = vsub.f32 %v99_v16, %v100_v22  ;;  %v246_v30 = vand.u32 4294901760, %v245_v24  ;;  %v109_v34 = vsub.f32 %v107_v20, %v108_v28  ;;  %v221_v35 = vsub.f32 %v2146_v21, %v220_v29 }
   0xb   :  { %v214_v32 = vand.u32 4294901760, %v213_v27  ;;  %v116_v40 = vand.u32 4294901760, %v115_v36  ;;  %v123_v44 = vsub.f32 %v43_v37, %v2165_v41  ;;  %v131_v51 = vsub.f32 %v46_v45, %v2174_v48 }
   0xc   :  { %v102_v31 = vand.u32 4294901760, %v101_v26  ;;  %247 = vmatpush.msra.mxu1 %v246_v30  ;;  %1974 = vmatpush.msra.mxu3 %v246_v30  ;;  %v110_v38 = vand.u32 4294901760, %v109_v34  ;;  %v222_v39 = vand.u32 4294901760, %v221_v35  ;;  %v49_v52 = vsel %vm32_vm0, %v21_v49, 0 }
   0xd   :  { %215 = vmatmul.f32.vlgmr.msra.gmra.mxu2 %v214_v32  ;;  %249 = vmatmul.f32.vlgmr.msra.gmra.mxu1 %v2128_v9  ;;  %v117_v43 = vsub.f32 %v115_v36, %v116_v40  ;;  %v124_v47 = vand.u32 4294901760, %v123_v44  ;;  %v132_v54 = vand.u32 4294901760, %v131_v51  ;;  %v2182_v55 = vand.u32 4294901760, %v49_v52 }
   0xe   :  { %103 = vmatmul.f32.vlgmr.msra.gmra.mxu0 %v102_v31  ;;  %305 = vmatmul.f32.vlgmr.msra.gmra.mxu3 %v2130_v10  ;;  %v52_v59 = vsel %vm32_vm0, %v2187_v56, 0  ;;  %v58_v13 = vsel %vm32_vm0, %v2209_v8, 0  ;;  %v2231_v31 = vld [vmem:[%s3291_s1 + $0x50] sm:$0xff] }
   0xf   :  { %428 = vmatpush.msrb.mxu3 %v96_v3  ;;  %626 = vmatpush.msrb.mxu1 %v96_v3  ;;  %v118_v46 = vand.u32 4294901760, %v117_v43  ;;  %v125_v50 = vsub.f32 %v123_v44, %v124_v47  ;;  %v133_v57 = vsub.f32 %v131_v51, %v132_v54  ;;  %v139_v58 = vsub.f32 %v49_v52, %v2182_v55 }
  0x10   :  { %v2193_v62 = vand.u32 4294901760, %v52_v59  ;;  %v55_v3 = vsel %vm32_vm0, %v2198_v63, 0  ;;  %v2215_v19 = vand.u32 4294901760, %v58_v13  ;;  %3307 = vst [vmem:[#allocation10_spill] sm:$0xff] %v2231_v31  ;;  %v64_v34 = vsel %vm32_vm0, %v2231_v31, 0 }
  0x11   :  { %v126_v53 = vand.u32 4294901760, %v125_v50  ;;  %v134_v60 = vand.u32 4294901760, %v133_v57  ;;  %v140_v61 = vand.u32 4294901760, %v139_v58  ;;  %v2204_v6 = vand.u32 4294901760, %v55_v3 }
  0x12   :  { %v147_v1 = vsub.f32 %v52_v59, %v2193_v62  ;;  %v163_v24 = vsub.f32 %v58_v13, %v2215_v19  ;;  %v2237_v37 = vand.u32 4294901760, %v64_v34 }
  0x13   :  { %v141_v0 = vsub.f32 %v139_v58, %v140_v61  ;;  %v155_v12 = vsub.f32 %v55_v3, %v2204_v6 }
  0x14   :  { %v148_v5 = vand.u32 4294901760, %v147_v1 }
  0x15   :  { %223 = vmatmul.f32.gmra.mxu2 %v222_v39  ;;  %253 = vmatmul.f32.gmra.mxu1 %v2135_v14  ;;  %v142_v4 = vand.u32 4294901760, %v141_v0  ;;  %v156_v18 = vand.u32 4294901760, %v155_v12 }
  0x16   :  { %111 = vmatmul.f32.gmra.mxu0 %v110_v38  ;;  %309 = vmatmul.f32.gmra.mxu3 %v2137_v15  ;;  %v149_v11 = vsub.f32 %v147_v1, %v148_v5  ;;  %v2242_v38 = vld [vmem:[%s3291_s1 + $0x58] sm:$0xff] }
  0x17   :  { %v67_v42 = vsel %vm32_vm0, %v2242_v38, 0 }
  0x18   :  { %v2248_v45 = vand.u32 4294901760, %v67_v42 }
  0x1a   :  { %v187_v49 = vsub.f32 %v67_v42, %v2248_v45 }
  0x1c   :  { %v188_v52 = vand.u32 4294901760, %v187_v49 }
  0x1d   :  { %333 = vmatmul.f32.vlgmr.msrb.gmra.mxu2 %v99_v16  ;;  %257 = vmatmul.f32.gmra.mxu1 %v2149_v25  ;;  %v150_v16 = vand.u32 4294901760, %v149_v11 }
  0x1e   :  { %119 = vmatmul.f32.gmra.mxu0 %v118_v46  ;;  %432 = vmatmul.f32.vlgmr.msrb.gmra.mxu3 %v100_v22  ;;  %v157_v22 = vsub.f32 %v155_v12, %v156_v18  ;;  %v2253_v46 = vld [vmem:[%s3291_s1 + $0x60] sm:$0xff]  ;;  %v189_v57 = vsub.f32 %v187_v49, %v188_v52 }
  0x1f   :  { %3308 = vst [vmem:[#allocation11_spill] sm:$0xff] %v2253_v46  ;;  %v70_v50 = vsel %vm32_vm0, %v2253_v46, 0 }
  0x20   :  { %v158_v27 = vand.u32 4294901760, %v157_v22 }
  0x25   :  { %338 = vmatmul.f32.gmra.mxu2 %v107_v20  ;;  %261 = vmatmul.f32.gmra.mxu1 %v2165_v41  ;;  %v2220_v20 = vld [vmem:[%s3291_s1 + $0x48] sm:$0xff] }
  0x26   :  { %127 = vmatmul.f32.gmra.mxu0 %v126_v53  ;;  %438 = vmatmul.f32.gmra.mxu3 %v108_v28  ;;  %3306 = vst [vmem:[#allocation9_spill] sm:$0xff] %v2220_v20  ;;  %v61_v26 = vsel %vm32_vm0, %v2220_v20, 0  ;;  %v164_v28 = vand.u32 4294901760, %v163_v24  ;;  %v2259_v53 = vand.u32 4294901760, %v70_v50 }
  0x27   :  { %v2226_v30 = vand.u32 4294901760, %v61_v26 }
  0x28   :  { %v165_v32 = vsub.f32 %v163_v24, %v164_v28 }
  0x29   :  { %v171_v33 = vsub.f32 %v61_v26, %v2226_v30 }
  0x2a   :  { %v166_v35 = vand.u32 4294901760, %v165_v32 }
  0x2d   :  { %343 = vmatmul.f32.gmra.mxu2 %v115_v36  ;;  %265 = vmatmul.f32.gmra.mxu1 %v2174_v48  ;;  %v172_v36 = vand.u32 4294901760, %v171_v33 }
  0x2e   :  { %135 = vmatmul.f32.gmra.mxu0 %v134_v60  ;;  %444 = vmatmul.f32.gmra.mxu3 %v116_v40  ;;  %v179_v40 = vsub.f32 %v64_v34, %v2237_v37  ;;  %v190_v60 = vand.u32 4294901760, %v189_v57 }
  0x2f   :  { %v173_v39 = vsub.f32 %v171_v33, %v172_v36 }
  0x31   :  { %v174_v43 = vand.u32 4294901760, %v173_v39 }
  0x35   :  { %348 = vmatmul.f32.gmra.mxu2 %v123_v44  ;;  %269 = vmatmul.f32.gmra.mxu1 %v2182_v55  ;;  %v180_v44 = vand.u32 4294901760, %v179_v40 }
  0x36   :  { %143 = vmatmul.f32.gmra.mxu0 %v142_v4  ;;  %450 = vmatmul.f32.gmra.mxu3 %v124_v47 }
  0x37   :  { %v181_v47 = vsub.f32 %v179_v40, %v180_v44 }
  0x3d   :  { %353 = vmatmul.f32.gmra.mxu2 %v131_v51  ;;  %273 = vmatmul.f32.gmra.mxu1 %v2193_v62  ;;  %v182_v51 = vand.u32 4294901760, %v181_v47 }
  0x3e   :  { %151 = vmatmul.f32.gmra.mxu0 %v150_v16  ;;  %456 = vmatmul.f32.gmra.mxu3 %v132_v54  ;;  %v2264_v54 = vld [vmem:[%s3291_s1 + $0x68] sm:$0xff] }
  0x3f   :  { %v73_v59 = vsel %vm32_vm0, %v2264_v54, 0 }
  0x40   :  { %v2270_v0 = vand.u32 4294901760, %v73_v59 }
  0x42   :  { %v203_v3 = vsub.f32 %v73_v59, %v2270_v0 }
  0x45   :  { %358 = vmatmul.f32.gmra.mxu2 %v139_v58  ;;  %277 = vmatmul.f32.gmra.mxu1 %v2204_v6  ;;  %v195_v58 = vsub.f32 %v70_v50, %v2259_v53 }
  0x46   :  { %159 = vmatmul.f32.gmra.mxu0 %v158_v27  ;;  %462 = vmatmul.f32.gmra.mxu3 %v140_v61 }
  0x47   :  { %v196_v61 = vand.u32 4294901760, %v195_v58 }
  0x4d   :  { %363 = vmatmul.f32.gmra.mxu2 %v147_v1  ;;  %281 = vmatmul.f32.gmra.mxu1 %v2215_v19  ;;  %v197_v1 = vsub.f32 %v195_v58, %v196_v61 }
  0x4e   :  { %167 = vmatmul.f32.gmra.mxu0 %v166_v35  ;;  %468 = vmatmul.f32.gmra.mxu3 %v148_v5  ;;  %v204_v5 = vand.u32 4294901760, %v203_v3 }
  0x4f   :  { %v198_v4 = vand.u32 4294901760, %v197_v1 }
  0x50   :  { %v205_v11 = vsub.f32 %v203_v3, %v204_v5 }
  0x55   :  { %368 = vmatmul.f32.gmra.mxu2 %v155_v12  ;;  %285 = vmatmul.f32.gmra.mxu1 %v2226_v30  ;;  %v206_v12 = vand.u32 4294901760, %v205_v11 }
  0x56   :  { %175 = vmatmul.f32.gmra.mxu0 %v174_v43  ;;  %474 = vmatmul.f32.gmra.mxu3 %v156_v18 }
  0x5d   :  { %373 = vmatmul.f32.gmra.mxu2 %v163_v24  ;;  %289 = vmatmul.f32.gmra.mxu1 %v2237_v37 }
  0x5e   :  { %183 = vmatmul.f32.gmra.mxu0 %v182_v51  ;;  %480 = vmatmul.f32.gmra.mxu3 %v164_v28 }
  0x65   :  { %378 = vmatmul.f32.gmra.mxu2 %v171_v33  ;;  %293 = vmatmul.f32.gmra.mxu1 %v2248_v45 }
  0x66   :  { %191 = vmatmul.f32.gmra.mxu0 %v190_v60  ;;  %486 = vmatmul.f32.gmra.mxu3 %v172_v36 }
  0x6d   :  { %383 = vmatmul.f32.gmra.mxu2 %v179_v40  ;;  %297 = vmatmul.f32.gmra.mxu1 %v2259_v53 }
  0x6e   :  { %199 = vmatmul.f32.gmra.mxu0 %v198_v4  ;;  %492 = vmatmul.f32.gmra.mxu3 %v180_v44 }
  0x75   :  { %388 = vmatmul.f32.gmra.mxu2 %v187_v49  ;;  %301 = vmatmul.f32.gmra.mxu1 %v2270_v0 }
  0x76   :  { %207 = vmatmul.f32.gmra.mxu0 %v206_v12  ;;  %498 = vmatmul.f32.gmra.mxu3 %v188_v52 }
  0x7d   :  { %393 = vmatmul.f32.gmra.mxu2 %v195_v58  ;;  %628 = vmatmul.f32.vlgmr.msrb.gmra.mxu1 %v2128_v9 }
  0x7e   :  { %546 = vmatmul.f32.vlgmr.msrb.gmra.mxu0 %v2128_v9  ;;  %504 = vmatmul.f32.gmra.mxu3 %v196_v61 }
  0x85   :  { %398 = vmatmul.f32.gmra.mxu2 %v203_v3  ;;  %632 = vmatmul.f32.gmra.mxu1 %v2135_v14 }
  0x86   :  { %550 = vmatmul.f32.gmra.mxu0 %v2135_v14  ;;  %510 = vmatmul.f32.gmra.mxu3 %v204_v5 }
  0x8a   :  { %v2282_v16 = vpop.f32.mrf.mxu1 }
  0x8b   :  { %v2280_v13 = vpop.f32.mrf.mxu0  ;;  %3310 = vst [vmem:[#allocation13_spill] sm:$0xff] %v2282_v16 }
  0x8c   :  { %3309 = vst [vmem:[#allocation12_spill] sm:$0xff] %v2280_v13 }
  0x8d   :  { %403 = vmatmul.f32.gmra.mxu2 %v2141_v17  ;;  %636 = vmatmul.f32.gmra.mxu1 %v2149_v25 }
  0x8e   :  { %554 = vmatmul.f32.gmra.mxu0 %v2149_v25  ;;  %516 = vmatmul.f32.gmra.mxu3 %v212_v23 }
  0x91   :  { %v2334_v27 = vpop.f32.mrf.mxu3 }
  0x92   :  { %v2291_v18 = vpop.f32.mrf.mxu1 }
  0x93   :  { %v2289_v9 = vpop.f32.mrf.mxu0  ;;  %3312 = vst [vmem:[#allocation15_spill] sm:$0xff] %v2291_v18 }
  0x94   :  { %3311 = vst [vmem:[#allocation14_spill] sm:$0xff] %v2289_v9 }
  0x95   :  { %408 = vmatmul.f32.gmra.mxu2 %v2146_v21  ;;  %640 = vmatmul.f32.gmra.mxu1 %v2165_v41 }
  0x96   :  { %558 = vmatmul.f32.gmra.mxu0 %v2165_v41  ;;  %522 = vmatmul.f32.gmra.mxu3 %v220_v29 }
  0x9a   :  { %v2300_v22 = vpop.f32.mrf.mxu1 }
  0x9b   :  { %v2298_v14 = vpop.f32.mrf.mxu0  ;;  %3314 = vst [vmem:[#allocation17_spill] sm:$0xff] %v2300_v22 }
  0x9c   :  { %3313 = vst [vmem:[#allocation16_spill] sm:$0xff] %v2298_v14 }
  0x9d   :  { %644 = vmatmul.f32.gmra.mxu1 %v2174_v48 }
  0x9e   :  { %562 = vmatmul.f32.gmra.mxu0 %v2174_v48 }
  0xa2   :  { %v2306_v23 = vpop.f32.mrf.mxu1 }
  0xa3   :  { %v2304_v17 = vpop.f32.mrf.mxu0  ;;  %3315 = vst [vmem:[#allocation18_spill] sm:$0xff] %v2306_v23 }
  0xa5   :  { %648 = vmatmul.f32.gmra.mxu1 %v2182_v55 }
  0xa6   :  { %566 = vmatmul.f32.gmra.mxu0 %v2182_v55  ;;  %v2328_v55 = vpop.f32.mrf.mxu2 }
  0xaa   :  { %v2312_v25 = vpop.f32.mrf.mxu1 }
  0xab   :  { %v2310_v21 = vpop.f32.mrf.mxu0 }
  0xad   :  { %652 = vmatmul.f32.gmra.mxu1 %v2193_v62 }
  0xae   :  { %570 = vmatmul.f32.gmra.mxu0 %v2193_v62 }
  0xb2   :  { %v2318_v41 = vpop.f32.mrf.mxu1 }
  0xb3   :  { %v2316_v29 = vpop.f32.mrf.mxu0 }
  0xb5   :  { %656 = vmatmul.f32.gmra.mxu1 %v2204_v6 }
  0xb6   :  { %574 = vmatmul.f32.gmra.mxu0 %v2204_v6  ;;  %v2338_v6 = vpop.f32.mrf.mxu2 }
  0xba   :  { %v2324_v24 = vpop.f32.mrf.mxu1 }
  0xbb   :  { %v2322_v48 = vpop.f32.mrf.mxu0 }
  0xbd   :  { %660 = vmatmul.f32.gmra.mxu1 %v2215_v19 }
  0xbe   :  { %578 = vmatmul.f32.gmra.mxu0 %v2215_v19  ;;  %v2345_v19 = vpop.f32.mrf.mxu3  ;;  %v2350_v34 = vpop.f32.mrf.mxu2 }
  0xbf   :  { %3316 = vst [vmem:[#allocation19_spill] sm:$0xff] %v2350_v34 }
  0xc2   :  { %v2332_v62 = vpop.f32.mrf.mxu1 }
  0xc3   :  { %v2330_v26 = vpop.f32.mrf.mxu0 }
  0xc5   :  { %664 = vmatmul.f32.gmra.mxu1 %v2226_v30 }
  0xc6   :  { %582 = vmatmul.f32.gmra.mxu0 %v2226_v30  ;;  %v2356_v30 = vpop.f32.mrf.mxu3  ;;  %v2362_v40 = vpop.f32.mrf.mxu2 }
  0xc7   :  { %3317 = vst [vmem:[#allocation20_spill] sm:$0xff] %v2356_v30 }
  0xc8   :  { %3318 = vst [vmem:[#allocation21_spill] sm:$0xff] %v2362_v40 }
  0xca   :  { %v2342_v32 = vpop.f32.mrf.mxu1 }
  0xcb   :  { %v2340_v28 = vpop.f32.mrf.mxu0 }
  0xcd   :  { %668 = vmatmul.f32.gmra.mxu1 %v2237_v37 }
  0xce   :  { %586 = vmatmul.f32.gmra.mxu0 %v2237_v37  ;;  %v2366_v37 = vpop.f32.mrf.mxu3  ;;  %v2374_v44 = vpop.f32.mrf.mxu2 }
  0xcf   :  { %3319 = vst [vmem:[#allocation22_spill] sm:$0xff] %v2366_v37 }
  0xd0   :  { %3320 = vst [vmem:[#allocation23_spill] sm:$0xff] %v2374_v44 }
  0xd2   :  { %v2352_v35 = vpop.f32.mrf.mxu1 }
  0xd3   :  { %v2348_v33 = vpop.f32.mrf.mxu0 }
  0xd5   :  { %672 = vmatmul.f32.gmra.mxu1 %v2248_v45 }
  0xd6   :  { %590 = vmatmul.f32.gmra.mxu0 %v2248_v45  ;;  %v2376_v49 = vpop.f32.mrf.mxu3  ;;  %v2380_v50 = vpop.f32.mrf.mxu2 }
  0xd7   :  { %3321 = vst [vmem:[#allocation24_spill] sm:$0xff] %v2376_v49 }
  0xd8   :  { %3322 = vst [vmem:[#allocation25_spill] sm:$0xff] %v2380_v50 }
  0xda   :  { %v2360_v39 = vpop.f32.mrf.mxu1 }
  0xdb   :  { %v2358_v36 = vpop.f32.mrf.mxu0 }
  0xdd   :  { %676 = vmatmul.f32.gmra.mxu1 %v2259_v53 }
  0xde   :  { %594 = vmatmul.f32.gmra.mxu0 %v2259_v53  ;;  %v2383_v53 = vpop.f32.mrf.mxu3  ;;  %v2388_v58 = vpop.f32.mrf.mxu2 }
  0xdf   :  { %3323 = vst [vmem:[#allocation26_spill] sm:$0xff] %v2383_v53 }
  0xe0   :  { %3325 = vst [vmem:[#allocation28_spill] sm:$0xff] %v2388_v58 }
  0xe2   :  { %v2370_v43 = vpop.f32.mrf.mxu1 }
  0xe3   :  { %v2368_v42 = vpop.f32.mrf.mxu0 }
  0xe4   :  { %v295_v22 = vadd.f32 %v2370_v43, %v2368_v42 }
  0xe5   :  { %680 = vmatmul.f32.gmra.mxu1 %v2270_v0 }
  0xe6   :  { %598 = vmatmul.f32.gmra.mxu0 %v2270_v0  ;;  %v2392_v60 = vpop.f32.mrf.mxu3  ;;  %v2398_v0 = vpop.f32.mrf.mxu2 }
  0xe7   :  { %3327 = vst [vmem:[#allocation30_spill] sm:$0xff] %v2392_v60 }
  0xea   :  { %v298_v47 = vpop.f32.mrf.mxu1 }
  0xeb   :  { %v200_v45 = vpop.f32.mrf.mxu0 }
  0xed   :  { %684 = vmatmul.f32.gmra.mxu1 %v2130_v10 }
  0xee   :  { %602 = vmatmul.f32.gmra.mxu0 %v2130_v10  ;;  %v2400_v1 = vpop.f32.mrf.mxu3 }
  0xef   :  { %3330 = vst [vmem:[#allocation33_spill] sm:$0xff] %v2400_v1  ;;  %v307_v1 = vadd.f32 %v2334_v27, %v2328_v55 }
  0xf2   :  { %v302_v52 = vpop.f32.mrf.mxu1 }
  0xf3   :  { %v208_v51 = vpop.f32.mrf.mxu0 }
  0xf5   :  { %688 = vmatmul.f32.gmra.mxu1 %v2137_v15 }
  0xf6   :  { %606 = vmatmul.f32.gmra.mxu0 %v2137_v15  ;;  %v2406_v15 = vpop.f32.mrf.mxu2  ;;  %v2412_v12 = vpop.f32.mrf.mxu3 }
  0xf7   :  { %3335 = vst [vmem:[#allocation38_spill] sm:$0xff] %v2412_v12 }
  0xfa   :  { %v2390_v59 = vpop.f32.mrf.mxu1 }
  0xfb   :  { %v2386_v57 = vpop.f32.mrf.mxu0  ;;  %3326 = vst [vmem:[#allocation29_spill] sm:$0xff] %v2390_v59 }
  0xfc   :  { %3324 = vst [vmem:[#allocation27_spill] sm:$0xff] %v2386_v57 }
  0xfe   :  { %v2414_v56 = vpop.f32.mrf.mxu2  ;;  %v2420_v63 = vpop.f32.mrf.mxu3 }
  0xff   :  { %3338 = vst [vmem:[#allocation41_spill] sm:$0xff] %v2420_v63 }
 0x102   :  { %v2396_v10 = vpop.f32.mrf.mxu1 }
 0x103   :  { %v2394_v61 = vpop.f32.mrf.mxu0  ;;  %3329 = vst [vmem:[#allocation32_spill] sm:$0xff] %v2396_v10 }
 0x104   :  { %3328 = vst [vmem:[#allocation31_spill] sm:$0xff] %v2394_v61 }
 0x106   :  { %v374_v8 = vpop.f32.mrf.mxu2  ;;  %v2426_v20 = vpop.f32.mrf.mxu3 }
 0x10a   :  { %v2404_v4 = vpop.f32.mrf.mxu1 }
 0x10b   :  { %v2402_v3 = vpop.f32.mrf.mxu0  ;;  %3332 = vst [vmem:[#allocation35_spill] sm:$0xff] %v2404_v4 }
 0x10c   :  { %3331 = vst [vmem:[#allocation34_spill] sm:$0xff] %v2402_v3 }
 0x10e   :  { %v379_v30 = vpop.f32.mrf.mxu2  ;;  %v2432_v3 = vpop.f32.mrf.mxu3 }
 0x112   :  { %v2410_v11 = vpop.f32.mrf.mxu1 }
 0x113   :  { %v2408_v5 = vpop.f32.mrf.mxu0  ;;  %3334 = vst [vmem:[#allocation37_spill] sm:$0xff] %v2410_v11 }
 0x114   :  { %3333 = vst [vmem:[#allocation36_spill] sm:$0xff] %v2408_v5 }
 0x116   :  { %v493_v31 = vpop.f32.mrf.mxu3 }
 0x11a   :  { %v2418_v10 = vpop.f32.mrf.mxu1 }
 0x11b   :  { %v2416_v59 = vpop.f32.mrf.mxu0  ;;  %3337 = vst [vmem:[#allocation40_spill] sm:$0xff] %v2418_v10  ;;  %v384_v10 = vpop.f32.mrf.mxu2 }
 0x11c   :  { %3336 = vst [vmem:[#allocation39_spill] sm:$0xff] %v2416_v59 }
 0x11e   :  { %v499_v40 = vpop.f32.mrf.mxu3 }
 0x122   :  { %v2424_v4 = vpop.f32.mrf.mxu1 }
 0x123   :  { %v2422_v57 = vpop.f32.mrf.mxu0  ;;  %3340 = vst [vmem:[#allocation43_spill] sm:$0xff] %v2424_v4  ;;  %v389_v4 = vpop.f32.mrf.mxu2 }
 0x124   :  { %3339 = vst [vmem:[#allocation42_spill] sm:$0xff] %v2422_v57 }
 0x126   :  { %v505_v46 = vpop.f32.mrf.mxu3 }
 0x12a   :  { %v2430_v11 = vpop.f32.mrf.mxu1 }
 0x12b   :  { %v2428_v61 = vpop.f32.mrf.mxu0  ;;  %3342 = vst [vmem:[#allocation45_spill] sm:$0xff] %v2430_v11  ;;  %v394_v16 = vpop.f32.mrf.mxu2 }
 0x12c   :  { %3341 = vst [vmem:[#allocation44_spill] sm:$0xff] %v2428_v61 }
 0x12e   :  { %v511_v60 = vpop.f32.mrf.mxu3 }
 0x132   :  { %v2436_v5 = vpop.f32.mrf.mxu1 }
 0x133   :  { %v2434_v37 = vpop.f32.mrf.mxu0  ;;  %3344 = vst [vmem:[#allocation47_spill] sm:$0xff] %v2436_v5  ;;  %v399_v5 = vpop.f32.mrf.mxu2 }
 0x134   :  { %3343 = vst [vmem:[#allocation46_spill] sm:$0xff] %v2434_v37  ;;  %v299_v37 = vadd.f32 %v298_v47, %v200_v45  ;;  %v311_v45 = vadd.f32 %v2345_v19, %v2338_v6 }
 0x136   :  { %v517_v50 = vpop.f32.mrf.mxu3  ;;  %v395_v14 = vadd.f32 %v394_v16, %v299_v37  ;;  %v271_v16 = vadd.f32 %v2318_v41, %v2316_v29  ;;  %v275_v29 = vadd.f32 %v2324_v24, %v2322_v48 }
 0x13a   :  { %v2440_v34 = vpop.f32.mrf.mxu1 }
 0x13b   :  { %v2438_v49 = vpop.f32.mrf.mxu0  ;;  %3346 = vst [vmem:[#allocation49_spill] sm:$0xff] %v2440_v34  ;;  %v404_v18 = vpop.f32.mrf.mxu2  ;;  %v303_v34 = vadd.f32 %v302_v52, %v208_v51  ;;  %v287_v51 = vadd.f32 %v2352_v35, %v2348_v33  ;;  %v506_v52 = vadd.f32 %v505_v46, %v395_v14  ;;  %v279_v46 = vadd.f32 %v2332_v62, %v2330_v26  ;;  %v3350_v26 = vld [vmem:[#allocation41_spill] sm:$0xff] }
 0x13c   :  { %3345 = vst [vmem:[#allocation48_spill] sm:$0xff] %v2438_v49  ;;  %v405_v58 = vadd.f32 %v404_v18, %v307_v1  ;;  %v390_v49 = vadd.f32 %v389_v4, %v295_v22  ;;  %v283_v18 = vadd.f32 %v2342_v32, %v2340_v28  ;;  %v2080_v35 = vmov 5  }
 0x13d   :  { %v380_v22 = vadd.f32 %v379_v30, %v287_v51  ;;  %v370_v41 = vadd.f32 %v2414_v56, %v279_v46  ;;  %1978 = vset.pattern.permute.xlu0 %v2080_v35  ;;  %1979 = vset.pattern.permute.xlu1 %v2080_v35  ;;  %v365_v56 = vadd.f32 %v2406_v15, %v275_v29  ;;  %v3362_v51 = vld [vmem:[#allocation15_spill] sm:$0xff] }
 0x13e   :  { %v518_v55 = vadd.f32 %v517_v50, %v405_v58  ;;  %v375_v14 = vadd.f32 %v374_v8, %v283_v18  ;;  %v523_v28 = vpop.f32.mrf.mxu3  ;;  %785 = vperm.xlu0 %1978, %v2123_v7   ;;  %777 = vperm.xlu1 %1979, %v2264_v54   ;;  %v360_v8 = vadd.f32 %v2398_v0, %v271_v16  ;;  %v3349_v7 = vld [vmem:[#allocation18_spill] sm:$0xff]  ;;  %v3354_v58 = vld [vmem:[#allocation16_spill] sm:$0xff]  ;;  %v3365_v18 = vld [vmem:[#allocation23_spill] sm:$0xff] }
 0x13f   :  { %v488_v30 = vadd.f32 %v2432_v3, %v380_v22  ;;  %1980 = vset.pattern.permute.xlu2 %v2080_v35  ;;  %v263_v54 = vadd.f32 %v3349_v7, %v2304_v17  ;;  %v476_v62 = vadd.f32 %v3350_v26, %v370_v41  ;;  %v3358_v17 = vld [vmem:[#allocation46_spill] sm:$0xff]  ;;  %v3359_v3 = vld [vmem:[#allocation33_spill] sm:$0xff]  ;;  %v3369_v46 = vld [vmem:[#allocation11_spill] sm:$0xff] }
 0x140   :  { %769 = vperm.xlu2 %1980, %v2242_v38   ;;  %v464_v4 = vadd.f32 %v3359_v3, %v360_v8  ;;  %v3366_v22 = vld [vmem:[#allocation30_spill] sm:$0xff]  ;;  %v3373_v41 = vld [vmem:[#allocation21_spill] sm:$0xff]  ;;  %v3379_v7 = vld [vmem:[#allocation24_spill] sm:$0xff] }
 0x141   :  { %v576_v0 = vadd.f32 %v3358_v17, %v476_v62  ;;  %v3377_v8 = vld [vmem:[#allocation45_spill] sm:$0xff]  ;;  %v3380_v26 = vld [vmem:[#allocation36_spill] sm:$0xff] }
 0x142   :  { %v2444_v53 = vpop.f32.mrf.mxu1  ;;  %v3385_v17 = vld [vmem:[#allocation20_spill] sm:$0xff] }
 0x143   :  { %v2442_v59 = vpop.f32.mrf.mxu0  ;;  %3347 = vst [vmem:[#allocation50_spill] sm:$0xff] %v2444_v53  ;;  %v400_v53 = vadd.f32 %v399_v5, %v303_v34  ;;  %v409_v27 = vpop.f32.mrf.mxu2 }
 0x144   :  { %v584_v48 = vadd.f32 %v2442_v59, %v488_v30  ;;  %v3375_v30 = vld [vmem:[#allocation39_spill] sm:$0xff] }
 0x145   :  { %v512_v63 = vadd.f32 %v511_v60, %v400_v53  ;;  %v3356_v60 = vld [vmem:[#allocation25_spill] sm:$0xff] }
 0x146   :  { %v350_v38 = vadd.f32 %v3356_v60, %v263_v54  ;;  %773 = vperm.xlu1 %1979, %v3369_v46   ;;  %v3393_v46 = vld [vmem:[#allocation32_spill] sm:$0xff] }
 0x14a   :  { %v2446_v13 = vpop.f32.mrf.mxu1  ;;  %v3360_v15 = vld [vmem:[#allocation50_spill] sm:$0xff] }
 0x14b   :  { %v587_v11 = vpop.f32.mrf.mxu0  ;;  %3348 = vst [vmem:[#allocation51_spill] sm:$0xff] %v2446_v13  ;;  %v291_v13 = vadd.f32 %v2360_v39, %v2358_v36  ;;  %v500_v39 = vadd.f32 %v499_v40, %v390_v49  ;;  %v3353_v49 = vld [vmem:[#allocation28_spill] sm:$0xff]  ;;  %v666_v5 = vadd.f32 %v3360_v15, %v584_v48  ;;  %v3378_v48 = vld [vmem:[#allocation19_spill] sm:$0xff] }
 0x14d   :  { %v385_v23 = vadd.f32 %v384_v10, %v291_v13 }
 0x152   :  { %v673_v57 = vpop.f32.mrf.mxu1  ;;  %v3352_v43 = vld [vmem:[#allocation51_spill] sm:$0xff] }
 0x153   :  { %v591_v2 = vpop.f32.mrf.mxu0 }
 0x154   :  { %v592_v33 = vadd.f32 %v591_v2, %v500_v39  ;;  %v267_v2 = vadd.f32 %v2312_v25, %v2310_v21  ;;  %v3351_v21 = vld [vmem:[#allocation48_spill] sm:$0xff] }
 0x156   :  { %v674_v24 = vadd.f32 %v673_v57, %v592_v33  ;;  %v3355_v57 = vld [vmem:[#allocation17_spill] sm:$0xff]  ;;  %v3372_v33 = vld [vmem:[#allocation47_spill] sm:$0xff] }
 0x157   :  { %v259_v59 = vadd.f32 %v3355_v57, %v3354_v58  ;;  %v3384_v57 = vld [vmem:[#allocation40_spill] sm:$0xff] }
 0x15a   :  { %v677_v61 = vpop.f32.mrf.mxu1 }
 0x15b   :  { %v595_v44 = vpop.f32.mrf.mxu0 }
 0x15c   :  { %v596_v13 = vadd.f32 %v595_v44, %v506_v52 }
 0x15e   :  { %v678_v40 = vadd.f32 %v677_v61, %v596_v13  ;;  %v3357_v61 = vld [vmem:[#allocation38_spill] sm:$0xff] }
 0x15f   :  { %v470_v10 = vadd.f32 %v3357_v61, %v365_v56  ;;  %v3367_v13 = vld [vmem:[#allocation42_spill] sm:$0xff] }
 0x162   :  { %v681_v12 = vpop.f32.mrf.mxu1 }
 0x163   :  { %v599_v9 = vpop.f32.mrf.mxu0 }
 0x164   :  { %v600_v34 = vadd.f32 %v599_v9, %v512_v63  ;;  %v494_v63 = vadd.f32 %v493_v31, %v385_v23  ;;  %v410_v9 = vadd.f32 %v409_v27, %v311_v45  ;;  %v482_v31 = vadd.f32 %v2426_v20, %v375_v14  ;;  %v3370_v14 = vld [vmem:[#allocation12_spill] sm:$0xff] }
 0x165   :  { %v355_v20 = vadd.f32 %v3353_v49, %v267_v2  ;;  %v3376_v2 = vld [vmem:[#allocation10_spill] sm:$0xff] }
 0x166   :  { %v682_v6 = vadd.f32 %v681_v12, %v600_v34  ;;  %v588_v32 = vadd.f32 %v587_v11, %v494_v63  ;;  %v524_v23 = vadd.f32 %v523_v28, %v410_v9  ;;  %v580_v25 = vadd.f32 %v3351_v21, %v482_v31  ;;  %v3361_v12 = vld [vmem:[#allocation14_spill] sm:$0xff]  ;;  %v3364_v34 = vld [vmem:[#allocation49_spill] sm:$0xff]  ;;  %765 = vperm.xlu2 %1980, %v3376_v2   ;;  %v3381_v21 = vld [vmem:[#allocation43_spill] sm:$0xff] }
 0x167   :  { %v255_v52 = vadd.f32 %v3362_v51, %v3361_v12  ;;  %v458_v39 = vadd.f32 %v3366_v22, %v355_v20  ;;  %v3371_v63 = vld [vmem:[#allocation13_spill] sm:$0xff]  ;;  %v3382_v20 = vld [vmem:[#allocation22_spill] sm:$0xff] }
 0x168   :  { %v670_v44 = vadd.f32 %v3352_v43, %v588_v32  ;;  %v662_v45 = vadd.f32 %v3364_v34, %v580_v25  ;;  %v251_v9 = vadd.f32 %v3371_v63, %v3370_v14  ;;  %v3374_v32 = vld [vmem:[#allocation26_spill] sm:$0xff]  ;;  %v3390_v34 = vld [vmem:[#allocation27_spill] sm:$0xff] }
 0x169   :  { %v340_v28 = vadd.f32 %v3373_v41, %v255_v52  ;;  %v452_v35 = vadd.f32 %v3374_v32, %v350_v38  ;;  %v3394_v32 = vld [vmem:[#allocation29_spill] sm:$0xff] }
 0x16a   :  { %v685_v42 = vpop.f32.mrf.mxu1 }
 0x16b   :  { %v603_v36 = vpop.f32.mrf.mxu0  ;;  %v560_v62 = vadd.f32 %v3380_v26, %v452_v35 }
 0x16c   :  { %v604_v37 = vadd.f32 %v603_v36, %v518_v55  ;;  %v3363_v55 = vld [vmem:[#allocation44_spill] sm:$0xff]  ;;  %v345_v36 = vadd.f32 %v3365_v18, %v259_v59 }
 0x16d   :  { %v572_v27 = vadd.f32 %v3363_v55, %v470_v10 }
 0x16e   :  { %v686_v19 = vadd.f32 %v685_v42, %v604_v37  ;;  %v568_v37 = vadd.f32 %v3367_v13, %v464_v4  ;;  %v3368_v42 = vld [vmem:[#allocation5_spill] sm:$0xff]  ;;  %v446_v54 = vadd.f32 %v3379_v7, %v345_v36  ;;  %v3392_v36 = vld [vmem:[#allocation7_spill] sm:$0xff] }
 0x16f   :  { %781 = vperm.xlu0 %1978, %v3368_v42   ;;  %v654_v56 = vadd.f32 %v3377_v8, %v572_v27  ;;  %v3387_v4 = vld [vmem:[#allocation37_spill] sm:$0xff]  ;;  %753 = vperm.xlu2 %1980, %v3392_v36  }
 0x170   :  { %1983 = vtanh.f32 %v686_v19  ;;  %v650_v25 = vadd.f32 %v3381_v21, %v568_v37  ;;  %v642_v15 = vadd.f32 %v3387_v4, %v560_v62 }
 0x171   :  { %1985 = vtanh.f32 %v682_v6  ;;  %v658_v6 = vadd.f32 %v3372_v33, %v576_v0 }
 0x172   :  { %1987 = vtanh.f32 %v678_v40  ;;  %v689_v53 = vpop.f32.mrf.mxu1  ;;  %v564_v40 = vadd.f32 %v3375_v30, %v458_v39 }
 0x173   :  { %v607_v47 = vpop.f32.mrf.mxu0  ;;  %1989 = vtanh.f32 %v674_v24  ;;  %v335_v24 = vadd.f32 %v3378_v48, %v251_v9 }
 0x174   :  { %v608_v50 = vadd.f32 %v607_v47, %v524_v23  ;;  %1991 = vtanh.f32 %v670_v44  ;;  %v646_v59 = vadd.f32 %v3384_v57, %v564_v40 }
 0x175   :  { %v434_v0 = vadd.f32 %v3385_v17, %v335_v24  ;;  %v3395_v24 = vld [vmem:[#allocation6_spill] sm:$0xff] }
 0x176   :  { %v1984_v1 = vpop.eup %1983  ;;  %v690_v11 = vadd.f32 %v689_v53, %v608_v50  ;;  %v440_v50 = vadd.f32 %v3382_v20, %v340_v28  ;;  %v3383_v53 = vld [vmem:[#allocation34_spill] sm:$0xff] }
 0x177   :  { %v1986_v16 = vpop.eup %1985  ;;  %v2502_v19 = vand.u32 4294901760, %v1984_v1  ;;  %v556_v58 = vadd.f32 %v3383_v53, %v446_v54 }
 0x178   :  { %1993 = vtanh.f32 %v690_v11  ;;  %v1988_v29 = vpop.eup %1987  ;;  %v2509_v31 = vand.u32 4294901760, %v1986_v16  ;;  %v3389_v11 = vld [vmem:[#allocation8_spill] sm:$0xff] }
 0x179   :  { %1995 = vtanh.f32 %v666_v5  ;;  %v1990_v23 = vpop.eup %1989  ;;  %v2516_v44 = vsub.f32 %v1984_v1, %v2502_v19  ;;  %v2518_v47 = vand.u32 4294901760, %v1988_v29  ;;  %v3386_v1 = vld [vmem:[#allocation31_spill] sm:$0xff]  ;;  %v3388_v5 = vld [vmem:[#allocation9_spill] sm:$0xff]  ;;  %757 = vperm.xlu1 %1979, %v3389_v11  }
 0x17a   :  { %1997 = vtanh.f32 %v662_v45  ;;  %v1992_v43 = vpop.eup %1991  ;;  %v2526_v38 = vsub.f32 %v1986_v16, %v2509_v31  ;;  %v2528_v61 = vand.u32 4294901760, %v1990_v23  ;;  %v552_v3 = vadd.f32 %v3386_v1, %v440_v50  ;;  %761 = vperm.xlu0 %1978, %v3388_v5   ;;  %v3391_v16 = vld [vmem:[#allocation35_spill] sm:$0xff] }
 0x17b   :  { %1999 = vtanh.f32 %v658_v6  ;;  %v2541_v52 = vsub.f32 %v1988_v29, %v2518_v47  ;;  %v2543_v55 = vand.u32 4294901760, %v1992_v43  ;;  %v957_v27 = vand.u32 4294901760, %v2516_v44 }
 0x17c   :  { %2001 = vtanh.f32 %v654_v56  ;;  %v548_v45 = vadd.f32 %v3390_v34, %v434_v0  ;;  %v638_v18 = vadd.f32 %v3391_v16, %v556_v58  ;;  %v2553_v13 = vsub.f32 %v1990_v23, %v2528_v61 }
 0x17d   :  { %2003 = vtanh.f32 %v650_v25  ;;  %v963_v42 = vand.u32 4294901760, %v2526_v38  ;;  %v634_v14 = vadd.f32 %v3393_v46, %v552_v3  ;;  %v958_v6 = vsub.f32 %v2516_v44, %v957_v27 }
 0x17e   :  { %v1994_v49 = vpop.eup %1993  ;;  %2005 = vtanh.f32 %v646_v59  ;;  %v2571_v29 = vsub.f32 %v1992_v43, %v2543_v55  ;;  %v969_v41 = vand.u32 4294901760, %v2541_v52  ;;  %v630_v35 = vadd.f32 %v3394_v32, %v548_v45  ;;  %v708_v43 = vld [vmem:[%s3292_s2] sm:$0xff] }
 0x17f   :  { %v2523_v60 = vand.u32 4294901760, %v1994_v49  ;;  %v1996_v10 = vpop.eup %1995  ;;  %2007 = vtanh.f32 %v642_v15  ;;  %v964_v2 = vsub.f32 %v2526_v38, %v963_v42  ;;  %v975_v56 = vand.u32 4294901760, %v2553_v13 }
 0x180   :  { %v1998_v12 = vpop.eup %1997  ;;  %v2555_v37 = vand.u32 4294901760, %v1996_v10  ;;  %2009 = vtanh.f32 %v638_v18  ;;  %v959_v7 = vand.u32 4294901760, %v958_v6  ;;  %v970_v54 = vsub.f32 %v2541_v52, %v969_v41 }
 0x181   :  { %789 = vmatpush.msra.mxu2 %v2523_v60  ;;  %1240 = vmatpush.msra.mxu1 %v2523_v60  ;;  %v2538_v51 = vsub.f32 %v1994_v49, %v2523_v60  ;;  %v2000_v22 = vpop.eup %1999  ;;  %v2560_v63 = vand.u32 4294901760, %v1998_v12  ;;  %2011 = vtanh.f32 %v634_v14  ;;  %v981_v62 = vand.u32 4294901760, %v2571_v29 }
 0x182   :  { %v2002_v9 = vpop.eup %2001  ;;  %v2576_v30 = vand.u32 4294901760, %v2000_v22  ;;  %v2584_v8 = vsub.f32 %v1996_v10, %v2555_v37  ;;  %749 = vperm.xlu0 %1978, %v3395_v24   ;;  %2013 = vtanh.f32 %v630_v35  ;;  %v965_v49 = vand.u32 4294901760, %v964_v2 }
 0x183   :  { %791 = vmatpush.msra.mxu2 %v2502_v19  ;;  %1112 = vmatpush.msra.mxu0 %v2538_v51  ;;  %v951_v39 = vand.u32 4294901760, %v2538_v51  ;;  %v2004_v28 = vpop.eup %2003  ;;  %v2588_v48 = vand.u32 4294901760, %v2002_v9  ;;  %v2596_v26 = vsub.f32 %v1998_v12, %v2560_v63  ;;  %v976_v20 = vsub.f32 %v2553_v13, %v975_v56 }
 0x184   :  { %1242 = vmatpush.msra.mxu1 %v2502_v19  ;;  %v2006_v23 = vpop.eup %2005  ;;  %v2601_v25 = vand.u32 4294901760, %v2004_v28  ;;  %v2611_v50 = vsub.f32 %v2000_v22, %v2576_v30  ;;  %v987_v53 = vand.u32 4294901760, %v2584_v8  ;;  %v971_v10 = vand.u32 4294901760, %v970_v54 }
 0x185   :  { %793 = vmatpush.msra.mxu2 %v2509_v31  ;;  %1115 = vmatpush.msra.mxu0 %v2516_v44  ;;  %v952_v33 = vsub.f32 %v2538_v51, %v951_v39  ;;  %v2008_v21 = vpop.eup %2007  ;;  %v2617_v57 = vsub.f32 %v2002_v9, %v2588_v48  ;;  %v2619_v59 = vand.u32 4294901760, %v2006_v23  ;;  %v982_v17 = vsub.f32 %v2571_v29, %v981_v62  ;;  %v709_v9 = vld [vmem:[%s3292_s2 + $0x8] sm:$0xff]  ;;  %v2049_v44 = vld [vmem:[%s3291_s1 + $0x20] sm:$0xff] }
 0x186   :  { %1244 = vmatpush.msra.mxu1 %v2509_v31  ;;  %v2010_v58 = vpop.eup %2009  ;;  %v993_v0 = vand.u32 4294901760, %v2596_v26  ;;  %v2626_v1 = vand.u32 4294901760, %v708_v43  ;;  %v2630_v4 = vand.u32 4294901760, %v2008_v21  ;;  %v977_v15 = vand.u32 4294901760, %v976_v20  ;;  %741 = vperm.xlu2 %1980, %v2049_v44  }
 0x187   :  { %795 = vmatpush.msra.mxu2 %v2518_v47  ;;  %1118 = vmatpush.msra.mxu0 %v2526_v38  ;;  %v953_v40 = vand.u32 4294901760, %v952_v33  ;;  %v2012_v3 = vpop.eup %2011  ;;  %v988_v5 = vsub.f32 %v2584_v8, %v987_v53  ;;  %v2637_v11 = vsub.f32 %v2004_v28, %v2601_v25  ;;  %v999_v12 = vand.u32 4294901760, %v2611_v50 }
 0x188   :  { %1246 = vmatpush.msra.mxu1 %v2518_v47  ;;  %v2014_v34 = vpop.eup %2013  ;;  %v2643_v45 = vsub.f32 %v2006_v23, %v2619_v59  ;;  %v2645_v16 = vand.u32 4294901760, %v2010_v58  ;;  %v983_v18 = vand.u32 4294901760, %v982_v17  ;;  %v994_v36 = vsub.f32 %v2596_v26, %v993_v0 }
 0x189   :  { %797 = vmatpush.msra.mxu2 %v2528_v61  ;;  %954 = vmatpush.msra.mxu3 %v953_v40  ;;  %v1005_v22 = vand.u32 4294901760, %v2617_v57  ;;  %v2653_v46 = vsub.f32 %v708_v43, %v2626_v1  ;;  %v2657_v14 = vand.u32 4294901760, %v2012_v3  ;;  %v989_v33 = vand.u32 4294901760, %v988_v5 }
 0x18a   :  { %1121 = vmatpush.msra.mxu0 %v2541_v52  ;;  %1248 = vmatpush.msra.mxu1 %v2528_v61  ;;  %v1000_v6 = vsub.f32 %v2611_v50, %v999_v12  ;;  %v2667_v28 = vsub.f32 %v2008_v21, %v2630_v4  ;;  %v1011_v32 = vand.u32 4294901760, %v2637_v11  ;;  %v2673_v35 = vsub.f32 %v2010_v58, %v2645_v16  ;;  %v2050_v52 = vld [vmem:[%s3291_s1] sm:$0xff] }
 0x18b   :  { %799 = vmatpush.msra.mxu2 %v2543_v55  ;;  %960 = vmatpush.msra.mxu3 %v959_v7  ;;  %v2675_v40 = vand.u32 4294901760, %v2014_v34  ;;  %v1017_v2 = vand.u32 4294901760, %v2643_v45  ;;  %v995_v23 = vand.u32 4294901760, %v994_v36  ;;  %v1006_v24 = vsub.f32 %v2617_v57, %v1005_v22 }
 0x18c   :  { %1124 = vmatpush.msra.mxu0 %v2553_v13  ;;  %1250 = vmatpush.msra.mxu1 %v2543_v55  ;;  %v822_v7 = vand.u32 4294901760, %v2653_v46  ;;  %v2683_v54 = vand.u32 4294901760, %v709_v9  ;;  %v1001_v21 = vand.u32 4294901760, %v1000_v6  ;;  %v1012_v43 = vsub.f32 %v2637_v11, %v1011_v32 }
 0x18d   :  { %801 = vmatpush.msra.mxu2 %v2555_v37  ;;  %966 = vmatpush.msra.mxu3 %v965_v49  ;;  %v2692_v49 = vsub.f32 %v2012_v3, %v2657_v14  ;;  %v1023_v20 = vand.u32 4294901760, %v2667_v28  ;;  %v2698_v58 = vsub.f32 %v2014_v34, %v2675_v40  ;;  %v1007_v17 = vand.u32 4294901760, %v1006_v24  ;;  %v710_v34 = vld [vmem:[%s3292_s2 + $0x10] sm:$0xff] }
 0x18e   :  { %1127 = vmatpush.msra.mxu0 %v2571_v29  ;;  %1252 = vmatpush.msra.mxu1 %v2555_v37  ;;  %v1018_v3 = vsub.f32 %v2643_v45, %v1017_v2  ;;  %v2709_v5 = vsub.f32 %v709_v9, %v2683_v54  ;;  %v2052_v29 = vld [vmem:[%s3291_s1 + $0x8] sm:$0xff] }
 0x18f   :  { %803 = vmatpush.msra.mxu2 %v2560_v63  ;;  %972 = vmatpush.msra.mxu3 %v971_v10  ;;  %v3301_v10 = vand.u32 4294901760, %v2673_v35  ;;  %v1024_v36 = vsub.f32 %v2667_v28, %v1023_v20  ;;  %v1041_v6 = vand.u32 4294901760, %v2698_v58 }
 0x190   :  { %1130 = vmatpush.msra.mxu0 %v2584_v8  ;;  %1254 = vmatpush.msra.mxu1 %v2560_v63 }
 0x191   :  { %805 = vmatpush.msra.mxu2 %v2576_v30  ;;  %978 = vmatpush.msra.mxu3 %v977_v15  ;;  %v823_v15 = vsub.f32 %v2653_v46, %v822_v7  ;;  %v1030_v9 = vsub.f32 %v2673_v35, %v3301_v10 }
 0x192   :  { %1133 = vmatpush.msra.mxu0 %v2596_v26  ;;  %1256 = vmatpush.msra.mxu1 %v2576_v30 }
 0x193   :  { %807 = vmatpush.msra.mxu2 %v2588_v48  ;;  %984 = vmatpush.msra.mxu3 %v983_v18  ;;  %v1013_v18 = vand.u32 4294901760, %v1012_v43  ;;  %v824_v24 = vand.u32 4294901760, %v823_v15  ;;  %v2729_v43 = vand.u32 4294901760, %v710_v34  ;;  %v1042_v15 = vsub.f32 %v2698_v58, %v1041_v6 }
 0x194   :  { %1136 = vmatpush.msra.mxu0 %v2611_v50  ;;  %1258 = vmatpush.msra.mxu1 %v2588_v48 }
 0x195   :  { %809 = vmatpush.msra.mxu2 %v2601_v25  ;;  %990 = vmatpush.msra.mxu3 %v989_v33  ;;  %v1035_v33 = vand.u32 4294901760, %v2692_v49  ;;  %v1043_v51 = vand.u32 4294901760, %v1042_v15 }
 0x196   :  { %1139 = vmatpush.msra.mxu0 %v2617_v57  ;;  %1260 = vmatpush.msra.mxu1 %v2601_v25  ;;  %v715_v57 = vld [vmem:[%s3292_s2 + $0x38] sm:$0xff] }
 0x197   :  { %811 = vmatpush.msra.mxu2 %v2619_v59  ;;  %996 = vmatpush.msra.mxu3 %v995_v23  ;;  %v1019_v23 = vand.u32 4294901760, %v1018_v3  ;;  %v1036_v10 = vsub.f32 %v2692_v49, %v1035_v33  ;;  %v1031_v3 = vand.u32 4294901760, %v1030_v9  ;;  %v2047_v9 = vld [vmem:[%s3291_s1 + $0x18] sm:$0xff] }
 0x198   :  { %1142 = vmatpush.msra.mxu0 %v2637_v11  ;;  %1262 = vmatpush.msra.mxu1 %v2619_v59  ;;  %v2845_v11 = vand.u32 4294901760, %v715_v57 }
 0x199   :  { %813 = vmatpush.msra.mxu2 %v2630_v4  ;;  %1002 = vmatpush.msra.mxu3 %v1001_v21  ;;  %v830_v21 = vand.u32 4294901760, %v2709_v5 }
 0x19a   :  { %1145 = vmatpush.msra.mxu0 %v2643_v45  ;;  %1264 = vmatpush.msra.mxu1 %v2630_v4  ;;  %v716_v45 = vld [vmem:[%s3292_s2 + $0x40] sm:$0xff] }
 0x19b   :  { %815 = vmatpush.msra.mxu2 %v2645_v16  ;;  %1008 = vmatpush.msra.mxu3 %v1007_v17  ;;  %v1025_v17 = vand.u32 4294901760, %v1024_v36  ;;  %v711_v36 = vld [vmem:[%s3292_s2 + $0x18] sm:$0xff] }
 0x19c   :  { %1148 = vmatpush.msra.mxu0 %v2667_v28  ;;  %1266 = vmatpush.msra.mxu1 %v2645_v16 }
 0x19d   :  { %817 = vmatpush.msra.mxu2 %v2657_v14  ;;  %1014 = vmatpush.msra.mxu3 %v1013_v18  ;;  %v831_v18 = vsub.f32 %v2709_v5, %v830_v21 }
 0x19e   :  { %1151 = vmatpush.msra.mxu0 %v2673_v35  ;;  %1268 = vmatpush.msra.mxu1 %v2657_v14 }
 0x19f   :  { %819 = vmatpush.msra.mxu2 %v2675_v40  ;;  %1020 = vmatpush.msra.mxu3 %v1019_v23  ;;  %v837_v23 = vsub.f32 %v710_v34, %v2729_v43 }
 0x1a0   :  { %1154 = vmatpush.msra.mxu0 %v2692_v49  ;;  %1270 = vmatpush.msra.mxu1 %v2675_v40 }
 0x1a1   :  { %825 = vmatmul.f32.vlgmr.msra.gmra.mxu2 %v824_v24  ;;  %1026 = vmatpush.msra.mxu3 %v1025_v17  ;;  %v1037_v24 = vand.u32 4294901760, %v1036_v10  ;;  %v838_v34 = vand.u32 4294901760, %v837_v23  ;;  %v2758_v17 = vand.u32 4294901760, %v711_v36  ;;  %v2048_v10 = vld [vmem:[%s3291_s1 + $0x28] sm:$0xff] }
 0x1a2   :  { %1371 = vmatpush.msrb.mxu2 %v951_v39  ;;  %1157 = vmatpush.msra.mxu0 %v2698_v58  ;;  %v832_v39 = vand.u32 4294901760, %v831_v18 }
 0x1a3   :  { %1032 = vmatpush.msra.mxu3 %v1031_v3  ;;  %737 = vperm.xlu0 %1978, %v2047_v9   ;;  %v839_v38 = vsub.f32 %v837_v23, %v838_v34  ;;  %v719_v3 = vld [vmem:[%s3292_s2 + $0x58] sm:$0xff]  ;;  %v720_v9 = vld [vmem:[%s3292_s2 + $0x60] sm:$0xff] }
 0x1a4   :  { %1375 = vmatpush.msrb.mxu2 %v957_v27  ;;  %1160 = vmatmul.f32.vlgmr.msra.gmra.mxu0 %v2653_v46  ;;  %v845_v27 = vsub.f32 %v711_v36, %v2758_v17  ;;  %v2853_v46 = vand.u32 4294901760, %v716_v45 }
 0x1a5   :  { %1038 = vmatpush.msra.mxu3 %v1037_v24  ;;  %1274 = vmatmul.f32.vlgmr.msra.gmra.mxu1 %v822_v7 }
 0x1a6   :  { %1379 = vmatpush.msrb.mxu2 %v963_v42  ;;  %745 = vperm.xlu1 %1979, %v2048_v10   ;;  %v712_v42 = vld [vmem:[%s3292_s2 + $0x20] sm:$0xff]  ;;  %v846_v13 = vand.u32 4294901760, %v845_v27  ;;  %v885_v28 = vsub.f32 %v716_v45, %v2853_v46 }
 0x1a7   :  { %1044 = vmatpush.msra.mxu3 %v1043_v51  ;;  %729 = vperm.xlu2 %1980, %v2052_v29   ;;  %v722_v29 = vld [vmem:[%s3292_s2 + $0x70] sm:$0xff] }
 0x1a8   :  { %1383 = vmatpush.msrb.mxu2 %v969_v41  ;;  %1046 = vmatmul.f32.vlgmr.msra.gmra.mxu3 %v2626_v1  ;;  %v2786_v41 = vand.u32 4294901760, %v712_v42 }
 0x1a9   :  { %833 = vmatmul.f32.gmra.mxu2 %v832_v39  ;;  %1498 = vmatpush.msrb.mxu3 %v2523_v60  ;;  %v840_v60 = vand.u32 4294901760, %v839_v38  ;;  %v721_v38 = vld [vmem:[%s3292_s2 + $0x68] sm:$0xff] }
 0x1aa   :  { %1387 = vmatpush.msrb.mxu2 %v975_v56  ;;  %v853_v8 = vsub.f32 %v712_v42, %v2786_v41 }
 0x1ab   :  { %1500 = vmatpush.msrb.mxu3 %v2502_v19  ;;  %725 = vperm.xlu0 %1978, %v2050_v52   ;;  %v2051_v19 = vld [vmem:[%s3291_s1 + $0x10] sm:$0xff] }
 0x1ac   :  { %1391 = vmatpush.msrb.mxu2 %v981_v62  ;;  %1165 = vmatmul.f32.gmra.mxu0 %v2709_v5  ;;  %v714_v62 = vld [vmem:[%s3292_s2 + $0x30] sm:$0xff] }
 0x1ad   :  { %1502 = vmatpush.msrb.mxu3 %v2509_v31  ;;  %1280 = vmatmul.f32.gmra.mxu1 %v830_v21  ;;  %v847_v31 = vsub.f32 %v845_v27, %v846_v13 }
 0x1ae   :  { %1395 = vmatpush.msrb.mxu2 %v987_v53  ;;  %733 = vperm.xlu1 %1979, %v2051_v19   ;;  %v2830_v53 = vand.u32 4294901760, %v714_v62 }
 0x1af   :  { %1504 = vmatpush.msrb.mxu3 %v2518_v47  ;;  %v713_v47 = vld [vmem:[%s3292_s2 + $0x28] sm:$0xff]  ;;  %v848_v56 = vand.u32 4294901760, %v847_v31 }
 0x1b0   :  { %1399 = vmatpush.msrb.mxu2 %v993_v0  ;;  %1050 = vmatmul.f32.gmra.mxu3 %v2683_v54  ;;  %v2811_v26 = vand.u32 4294901760, %v713_v47 }
 0x1b1   :  { %841 = vmatmul.f32.gmra.mxu2 %v840_v60  ;;  %1506 = vmatpush.msrb.mxu3 %v2528_v61  ;;  %v854_v61 = vand.u32 4294901760, %v853_v8  ;;  %v2890_v60 = vand.u32 4294901760, %v721_v38 }
 0x1b2   :  { %1403 = vmatpush.msrb.mxu2 %v999_v12  ;;  %v877_v12 = vsub.f32 %v715_v57, %v2845_v11 }
 0x1b3   :  { %1508 = vmatpush.msrb.mxu3 %v2543_v55  ;;  %v855_v55 = vsub.f32 %v853_v8, %v854_v61  ;;  %v925_v19 = vsub.f32 %v721_v38, %v2890_v60 }
 0x1b4   :  { %1407 = vmatpush.msrb.mxu2 %v1005_v22  ;;  %1170 = vmatmul.f32.gmra.mxu0 %v837_v23  ;;  %v878_v22 = vand.u32 4294901760, %v877_v12  ;;  %v2874_v23 = vand.u32 4294901760, %v719_v3 }
 0x1b5   :  { %1510 = vmatpush.msrb.mxu3 %v2555_v37  ;;  %1286 = vmatmul.f32.gmra.mxu1 %v838_v34  ;;  %v861_v37 = vsub.f32 %v713_v47, %v2811_v26  ;;  %v856_v50 = vand.u32 4294901760, %v855_v55  ;;  %v2881_v34 = vand.u32 4294901760, %v720_v9 }
 0x1b6   :  { %1411 = vmatpush.msrb.mxu2 %v1011_v32  ;;  %v717_v32 = vld [vmem:[%s3292_s2 + $0x48] sm:$0xff]  ;;  %v909_v24 = vsub.f32 %v719_v3, %v2874_v23 }
 0x1b7   :  { %1512 = vmatpush.msrb.mxu3 %v2560_v63  ;;  %v3396_v63 = vand.u32 4294901760, %v2673_v35  ;;  %v917_v44 = vsub.f32 %v720_v9, %v2881_v34 }
 0x1b8   :  { %1415 = vmatpush.msrb.mxu2 %v1017_v2  ;;  %1054 = vmatmul.f32.gmra.mxu3 %v2729_v43  ;;  %v2860_v2 = vand.u32 4294901760, %v717_v32  ;;  %v910_v39 = vand.u32 4294901760, %v909_v24 }
 0x1b9   :  { %849 = vmatmul.f32.gmra.mxu2 %v848_v56  ;;  %1514 = vmatpush.msrb.mxu3 %v2576_v30  ;;  %v862_v30 = vand.u32 4294901760, %v861_v37  ;;  %v918_v52 = vand.u32 4294901760, %v917_v44  ;;  %v2899_v56 = vand.u32 4294901760, %v722_v29 }
 0x1ba   :  { %1419 = vmatpush.msrb.mxu2 %v1023_v20  ;;  %v893_v49 = vsub.f32 %v717_v32, %v2860_v2  ;;  %v718_v20 = vld [vmem:[%s3292_s2 + $0x50] sm:$0xff]  ;;  %v911_v10 = vsub.f32 %v909_v24, %v910_v39 }
 0x1bb   :  { %1516 = vmatpush.msrb.mxu3 %v2588_v48  ;;  %v863_v48 = vsub.f32 %v861_v37, %v862_v30  ;;  %v933_v55 = vsub.f32 %v722_v29, %v2899_v56 }
 0x1bc   :  { %1423 = vmatpush.msrb.mxu2 %v3396_v63  ;;  %1175 = vmatmul.f32.gmra.mxu0 %v845_v27  ;;  %v894_v5 = vand.u32 4294901760, %v893_v49  ;;  %v2888_v27 = vpop.permute.xlu0 %785  ;;  %v912_v42 = vand.u32 4294901760, %v911_v10 }
 0x1bd   :  { %1518 = vmatpush.msrb.mxu3 %v2601_v25  ;;  %1292 = vmatmul.f32.gmra.mxu1 %v846_v13  ;;  %v869_v25 = vsub.f32 %v714_v62, %v2830_v53  ;;  %v919_v13 = vsub.f32 %v917_v44, %v918_v52  ;;  %v934_v63 = vand.u32 4294901760, %v933_v55 }
 0x1be   :  { %1427 = vmatpush.msrb.mxu2 %v1035_v33  ;;  %v2867_v33 = vand.u32 4294901760, %v718_v20 }
 0x1bf   :  { %1520 = vmatpush.msrb.mxu3 %v2619_v59  ;;  %v864_v59 = vand.u32 4294901760, %v863_v48  ;;  %v870_v0 = vand.u32 4294901760, %v869_v25  ;;  %v920_v31 = vand.u32 4294901760, %v919_v13 }
 0x1c0   :  { %1431 = vmatpush.msrb.mxu2 %v1041_v6  ;;  %1058 = vmatmul.f32.gmra.mxu3 %v2758_v17  ;;  %v895_v6 = vsub.f32 %v893_v49, %v894_v5  ;;  %v901_v21 = vsub.f32 %v718_v20, %v2867_v33 }
 0x1c1   :  { %857 = vmatmul.f32.gmra.mxu2 %v856_v50  ;;  %1522 = vmatpush.msrb.mxu3 %v2630_v4  ;;  %v871_v4 = vsub.f32 %v869_v25, %v870_v0  ;;  %v2906_v50 = vpop.permute.xlu2 %769 }
 0x1c2   :  { %v896_v15 = vand.u32 4294901760, %v895_v6  ;;  %v902_v18 = vand.u32 4294901760, %v901_v21 }
 0x1c3   :  { %1524 = vmatpush.msrb.mxu3 %v2645_v16  ;;  %v872_v16 = vand.u32 4294901760, %v871_v4  ;;  %v2914_v4 = vpop.permute.xlu1 %777 }
 0x1c4   :  { %1180 = vmatmul.f32.gmra.mxu0 %v853_v8  ;;  %v903_v36 = vsub.f32 %v901_v21, %v902_v18  ;;  %v926_v8 = vand.u32 4294901760, %v925_v19 }
 0x1c5   :  { %1526 = vmatpush.msrb.mxu3 %v2657_v14  ;;  %1298 = vmatmul.f32.gmra.mxu1 %v854_v61  ;;  %v879_v14 = vsub.f32 %v877_v12, %v878_v22 }
 0x1c6   :  { %v904_v51 = vand.u32 4294901760, %v903_v36  ;;  %v927_v61 = vsub.f32 %v925_v19, %v926_v8 }
 0x1c7   :  { %1528 = vmatpush.msrb.mxu3 %v2675_v40  ;;  %v880_v35 = vand.u32 4294901760, %v879_v14  ;;  %v886_v40 = vand.u32 4294901760, %v885_v28 }
 0x1c8   :  { %1062 = vmatmul.f32.gmra.mxu3 %v2786_v41  ;;  %v928_v62 = vand.u32 4294901760, %v927_v61 }
 0x1c9   :  { %865 = vmatmul.f32.gmra.mxu2 %v864_v59  ;;  %v887_v7 = vsub.f32 %v885_v28, %v886_v40 }
 0x1cb   :  { %v888_v58 = vand.u32 4294901760, %v887_v7  ;;  %v2921_v14 = vpop.permute.xlu1 %773 }
 0x1cc   :  { %1185 = vmatmul.f32.gmra.mxu0 %v861_v37  ;;  %v723_v37 = vld [vmem:[%s3292_s2 + $0x78] sm:$0xff] }
 0x1cd   :  { %1304 = vmatmul.f32.gmra.mxu1 %v862_v30  ;;  %v2908_v30 = vand.u32 4294901760, %v723_v37 }
 0x1cf   :  { %v941_v57 = vsub.f32 %v723_v37, %v2908_v30 }
 0x1d0   :  { %1066 = vmatmul.f32.gmra.mxu3 %v2811_v26 }
 0x1d1   :  { %873 = vmatmul.f32.gmra.mxu2 %v872_v16 }
 0x1d4   :  { %1190 = vmatmul.f32.gmra.mxu0 %v869_v25  ;;  %v935_v25 = vsub.f32 %v933_v55, %v934_v63 }
 0x1d5   :  { %1310 = vmatmul.f32.gmra.mxu1 %v870_v0  ;;  %v942_v0 = vand.u32 4294901760, %v941_v57 }
 0x1d6   :  { %v936_v59 = vand.u32 4294901760, %v935_v25 }
 0x1d7   :  { %v943_v45 = vsub.f32 %v941_v57, %v942_v0 }
 0x1d8   :  { %1070 = vmatmul.f32.gmra.mxu3 %v2830_v53 }
 0x1d9   :  { %881 = vmatmul.f32.gmra.mxu2 %v880_v35 }
 0x1dc   :  { %1195 = vmatmul.f32.gmra.mxu0 %v877_v12  ;;  %v2916_v12 = vpop.permute.xlu2 %765 }
 0x1dd   :  { %1316 = vmatmul.f32.gmra.mxu1 %v878_v22  ;;  %v944_v22 = vand.u32 4294901760, %v943_v45 }
 0x1e0   :  { %1074 = vmatmul.f32.gmra.mxu3 %v2845_v11 }
 0x1e1   :  { %889 = vmatmul.f32.gmra.mxu2 %v888_v58  ;;  %v2897_v47 = vpop.permute.xlu0 %781 }
 0x1e4   :  { %1200 = vmatmul.f32.gmra.mxu0 %v885_v28  ;;  %v2924_v28 = vpop.permute.xlu2 %753 }
 0x1e5   :  { %1322 = vmatmul.f32.gmra.mxu1 %v886_v40 }
 0x1e8   :  { %1078 = vmatmul.f32.gmra.mxu3 %v2853_v46 }
 0x1e9   :  { %897 = vmatmul.f32.gmra.mxu2 %v896_v15 }
 0x1eb   :  { %v2928_v35 = vpop.permute.xlu1 %757 }
 0x1ec   :  { %1205 = vmatmul.f32.gmra.mxu0 %v893_v49  ;;  %v2910_v48 = vpop.permute.xlu0 %761  ;;  %v742_v49 = vpop.permute.xlu2 %741 }
 0x1ed   :  { %1328 = vmatmul.f32.gmra.mxu1 %v894_v5 }
 0x1f0   :  { %1082 = vmatmul.f32.gmra.mxu3 %v2860_v2 }
 0x1f1   :  { %905 = vmatmul.f32.gmra.mxu2 %v904_v51 }
 0x1f4   :  { %1210 = vmatmul.f32.gmra.mxu0 %v901_v21  ;;  %v2919_v16 = vpop.permute.xlu0 %749 }
 0x1f5   :  { %1334 = vmatmul.f32.gmra.mxu1 %v902_v18 }
 0x1f8   :  { %1086 = vmatmul.f32.gmra.mxu3 %v2867_v33 }
 0x1f9   :  { %913 = vmatmul.f32.gmra.mxu2 %v912_v42 }
 0x1fc   :  { %1215 = vmatmul.f32.gmra.mxu0 %v909_v24 }
 0x1fd   :  { %1340 = vmatmul.f32.gmra.mxu1 %v910_v39 }
 0x200   :  { %1090 = vmatmul.f32.gmra.mxu3 %v2874_v23 }
 0x201   :  { %921 = vmatmul.f32.gmra.mxu2 %v920_v31  ;;  %v730_v24 = vpop.permute.xlu2 %729 }
 0x204   :  { %1220 = vmatmul.f32.gmra.mxu0 %v917_v44 }
 0x205   :  { %1346 = vmatmul.f32.gmra.mxu1 %v918_v52 }
 0x208   :  { %1094 = vmatmul.f32.gmra.mxu3 %v2881_v34 }
 0x209   :  { %929 = vmatmul.f32.gmra.mxu2 %v928_v62 }
 0x20c   :  { %1225 = vmatmul.f32.gmra.mxu0 %v925_v19 }
 0x20d   :  { %1352 = vmatmul.f32.gmra.mxu1 %v926_v8 }
 0x210   :  { %1098 = vmatmul.f32.gmra.mxu3 %v2890_v60 }
 0x211   :  { %937 = vmatmul.f32.gmra.mxu2 %v936_v59 }
 0x214   :  { %1230 = vmatmul.f32.gmra.mxu0 %v933_v55 }
 0x215   :  { %1358 = vmatmul.f32.gmra.mxu1 %v934_v63  ;;  %v738_v32 = vpop.permute.xlu0 %737 }
 0x218   :  { %1102 = vmatmul.f32.gmra.mxu3 %v2899_v56  ;;  %v746_v15 = vpop.permute.xlu1 %745 }
 0x219   :  { %945 = vmatmul.f32.gmra.mxu2 %v944_v22 }
 0x21c   :  { %1235 = vmatmul.f32.gmra.mxu0 %v941_v57 }
 0x21d   :  { %1364 = vmatmul.f32.gmra.mxu1 %v942_v0  ;;  %v726_v58 = vpop.permute.xlu0 %725 }
 0x220   :  { %1106 = vmatmul.f32.gmra.mxu3 %v2908_v30  ;;  %v734_v52 = vpop.permute.xlu1 %733 }
 0x221   :  { %1433 = vmatmul.f32.vlgmr.msrb.gmra.mxu2 %v2626_v1  ;;  %v1161_v40 = vpop.f32.mrf.mxu0 }
 0x222   :  { %v1275_v7 = vpop.f32.mrf.mxu1 }
 0x224   :  { %v826_v20 = vpop.f32.mrf.mxu2 }
 0x225   :  { %v827_v5 = vadd.f32 %v826_v20, %v726_v58 }
 0x228   :  { %1530 = vmatmul.f32.vlgmr.msrb.gmra.mxu3 %v2626_v1 }
 0x229   :  { %1437 = vmatmul.f32.gmra.mxu2 %v2683_v54  ;;  %v1166_v6 = vpop.f32.mrf.mxu0 }
 0x22a   :  { %v1281_v21 = vpop.f32.mrf.mxu1 }
 0x22b   :  { %v1047_v3 = vpop.f32.mrf.mxu3 }
 0x22c   :  { %v834_v18 = vpop.f32.mrf.mxu2  ;;  %v1048_v36 = vadd.f32 %v1047_v3, %v827_v5 }
 0x22d   :  { %v835_v39 = vadd.f32 %v834_v18, %v730_v24 }
 0x22e   :  { %v1162_v9 = vadd.f32 %v1161_v40, %v1048_v36 }
 0x230   :  { %v2932_v51 = vadd.f32 %v1275_v7, %v1162_v9  ;;  %1534 = vmatmul.f32.gmra.mxu3 %v2683_v54 }
 0x231   :  { %1441 = vmatmul.f32.gmra.mxu2 %v2729_v43  ;;  %v1171_v10 = vpop.f32.mrf.mxu0 }
 0x232   :  { %v1287_v1 = vpop.f32.mrf.mxu1 }
 0x233   :  { %v1051_v44 = vpop.f32.mrf.mxu3 }
 0x234   :  { %v842_v38 = vpop.f32.mrf.mxu2  ;;  %v1052_v42 = vadd.f32 %v1051_v44, %v835_v39 }
 0x235   :  { %v843_v29 = vadd.f32 %v842_v38, %v734_v52 }
 0x236   :  { %v1167_v13 = vadd.f32 %v1166_v6, %v1052_v42 }
 0x238   :  { %v2936_v19 = vadd.f32 %v1281_v21, %v1167_v13  ;;  %1538 = vmatmul.f32.gmra.mxu3 %v2729_v43 }
 0x239   :  { %1445 = vmatmul.f32.gmra.mxu2 %v2758_v17  ;;  %v1176_v31 = vpop.f32.mrf.mxu0 }
 0x23a   :  { %v1293_v54 = vpop.f32.mrf.mxu1 }
 0x23b   :  { %v1055_v8 = vpop.f32.mrf.mxu3 }
 0x23c   :  { %v850_v61 = vpop.f32.mrf.mxu2  ;;  %v1056_v55 = vadd.f32 %v1055_v8, %v843_v29 }
 0x23d   :  { %v851_v62 = vadd.f32 %v850_v61, %v738_v32 }
 0x23e   :  { %v1172_v37 = vadd.f32 %v1171_v10, %v1056_v55 }
 0x240   :  { %v2940_v63 = vadd.f32 %v1287_v1, %v1172_v37  ;;  %1542 = vmatmul.f32.gmra.mxu3 %v2758_v17 }
 0x241   :  { %1449 = vmatmul.f32.gmra.mxu2 %v2786_v41  ;;  %v1181_v57 = vpop.f32.mrf.mxu0 }
 0x242   :  { %v1299_v0 = vpop.f32.mrf.mxu1 }
 0x243   :  { %v1059_v25 = vpop.f32.mrf.mxu3 }
 0x244   :  { %v858_v59 = vpop.f32.mrf.mxu2  ;;  %v1060_v43 = vadd.f32 %v1059_v25, %v851_v62 }
 0x245   :  { %v859_v22 = vadd.f32 %v858_v59, %v742_v49 }
 0x246   :  { %v1177_v45 = vadd.f32 %v1176_v31, %v1060_v43 }
 0x248   :  { %v2944_v40 = vadd.f32 %v1293_v54, %v1177_v45  ;;  %1546 = vmatmul.f32.gmra.mxu3 %v2786_v41 }
 0x249   :  { %1453 = vmatmul.f32.gmra.mxu2 %v2811_v26  ;;  %v1186_v58 = vpop.f32.mrf.mxu0 }
 0x24a   :  { %v1305_v5 = vpop.f32.mrf.mxu1 }
 0x24b   :  { %v1063_v32 = vpop.f32.mrf.mxu3 }
 0x24c   :  { %v866_v7 = vpop.f32.mrf.mxu2  ;;  %v1064_v20 = vadd.f32 %v1063_v32, %v859_v22 }
 0x24d   :  { %v867_v6 = vadd.f32 %v866_v7, %v746_v15 }
 0x24e   :  { %v1182_v17 = vadd.f32 %v1181_v57, %v1064_v20 }
 0x250   :  { %v2948_v21 = vadd.f32 %v1299_v0, %v1182_v17  ;;  %1550 = vmatmul.f32.gmra.mxu3 %v2811_v26 }
 0x251   :  { %1457 = vmatmul.f32.gmra.mxu2 %v2830_v53  ;;  %v1191_v41 = vpop.f32.mrf.mxu0 }
 0x252   :  { %v1311_v15 = vpop.f32.mrf.mxu1 }
 0x253   :  { %v1067_v49 = vpop.f32.mrf.mxu3 }
 0x254   :  { %v874_v3 = vpop.f32.mrf.mxu2  ;;  %v1068_v18 = vadd.f32 %v1067_v49, %v867_v6 }
 0x255   :  { %v875_v24 = vadd.f32 %v874_v3, %v2919_v16 }
 0x256   :  { %v1187_v36 = vadd.f32 %v1186_v58, %v1068_v18 }
 0x258   :  { %v2953_v9 = vadd.f32 %v1305_v5, %v1187_v36  ;;  %1554 = vmatmul.f32.gmra.mxu3 %v2830_v53 }
 0x259   :  { %1461 = vmatmul.f32.gmra.mxu2 %v2845_v11  ;;  %v1196_v16 = vpop.f32.mrf.mxu0 }
 0x25a   :  { %v1317_v52 = vpop.f32.mrf.mxu1 }
 0x25b   :  { %v1071_v39 = vpop.f32.mrf.mxu3 }
 0x25c   :  { %v882_v10 = vpop.f32.mrf.mxu2  ;;  %v1072_v1 = vadd.f32 %v1071_v39, %v875_v24 }
 0x25d   :  { %v883_v44 = vadd.f32 %v882_v10, %v2924_v28 }
 0x25e   :  { %v1192_v26 = vadd.f32 %v1191_v41, %v1072_v1 }
 0x260   :  { %v2958_v38 = vadd.f32 %v1311_v15, %v1192_v26  ;;  %1558 = vmatmul.f32.gmra.mxu3 %v2845_v11 }
 0x261   :  { %1465 = vmatmul.f32.gmra.mxu2 %v2853_v46  ;;  %v1201_v54 = vpop.f32.mrf.mxu0 }
 0x262   :  { %v1323_v55 = vpop.f32.mrf.mxu1 }
 0x263   :  { %v1075_v42 = vpop.f32.mrf.mxu3 }
 0x264   :  { %v890_v13 = vpop.f32.mrf.mxu2  ;;  %v1076_v53 = vadd.f32 %v1075_v42, %v883_v44 }
 0x265   :  { %v891_v31 = vadd.f32 %v890_v13, %v2928_v35 }
 0x266   :  { %v1197_v29 = vadd.f32 %v1196_v16, %v1076_v53 }
 0x268   :  { %v2963_v8 = vadd.f32 %v1317_v52, %v1197_v29  ;;  %1562 = vmatmul.f32.gmra.mxu3 %v2853_v46 }
 0x269   :  { %1469 = vmatmul.f32.gmra.mxu2 %v2860_v2 }
 0x26b   :  { %v1079_v28 = vpop.f32.mrf.mxu3 }
 0x26c   :  { %v898_v61 = vpop.f32.mrf.mxu2  ;;  %v1080_v11 = vadd.f32 %v1079_v28, %v891_v31 }
 0x26d   :  { %v899_v62 = vadd.f32 %v898_v61, %v2910_v48 }
 0x26e   :  { %v1202_v37 = vadd.f32 %v1201_v54, %v1080_v11  ;;  %v1206_v11 = vpop.f32.mrf.mxu0 }
 0x270   :  { %v2968_v25 = vadd.f32 %v1323_v55, %v1202_v37  ;;  %1566 = vmatmul.f32.gmra.mxu3 %v2860_v2 }
 0x271   :  { %1473 = vmatmul.f32.gmra.mxu2 %v2867_v33 }
 0x273   :  { %v1083_v35 = vpop.f32.mrf.mxu3 }
 0x274   :  { %v906_v57 = vpop.f32.mrf.mxu2  ;;  %v2972_v59 = vadd.f32 %v1083_v35, %v899_v62 }
 0x275   :  { %v907_v46 = vadd.f32 %v906_v57, %v2916_v12 }
 0x276   :  { %v1211_v57 = vpop.f32.mrf.mxu0 }
 0x278   :  { %1570 = vmatmul.f32.gmra.mxu3 %v2867_v33 }
 0x279   :  { %1477 = vmatmul.f32.gmra.mxu2 %v2874_v23 }
 0x27b   :  { %v1087_v43 = vpop.f32.mrf.mxu3 }
 0x27c   :  { %v914_v0 = vpop.f32.mrf.mxu2  ;;  %v2977_v45 = vadd.f32 %v1087_v43, %v907_v46 }
 0x27d   :  { %v915_v48 = vadd.f32 %v914_v0, %v2906_v50 }
 0x280   :  { %1574 = vmatmul.f32.gmra.mxu3 %v2874_v23 }
 0x281   :  { %1481 = vmatmul.f32.gmra.mxu2 %v2881_v34 }
 0x283   :  { %v1091_v2 = vpop.f32.mrf.mxu3 }
 0x284   :  { %v922_v22 = vpop.f32.mrf.mxu2  ;;  %v2982_v32 = vadd.f32 %v1091_v2, %v915_v48 }
 0x285   :  { %v923_v12 = vadd.f32 %v922_v22, %v2921_v14 }
 0x288   :  { %1578 = vmatmul.f32.gmra.mxu3 %v2881_v34 }
 0x289   :  { %1485 = vmatmul.f32.gmra.mxu2 %v2890_v60 }
 0x28b   :  { %v1095_v33 = vpop.f32.mrf.mxu3 }
 0x28c   :  { %v930_v7 = vpop.f32.mrf.mxu2  ;;  %v2987_v20 = vadd.f32 %v1095_v33, %v923_v12 }
 0x28d   :  { %v931_v50 = vadd.f32 %v930_v7, %v2914_v4 }
 0x290   :  { %1582 = vmatmul.f32.gmra.mxu3 %v2890_v60 }
 0x291   :  { %1489 = vmatmul.f32.gmra.mxu2 %v2899_v56 }
 0x293   :  { %v1099_v23 = vpop.f32.mrf.mxu3 }
 0x294   :  { %v938_v58 = vpop.f32.mrf.mxu2  ;;  %v2992_v17 = vadd.f32 %v1099_v23, %v931_v50 }
 0x295   :  { %v939_v14 = vadd.f32 %v938_v58, %v2897_v47 }
 0x298   :  { %1586 = vmatmul.f32.gmra.mxu3 %v2899_v56 }
 0x299   :  { %1493 = vmatmul.f32.gmra.mxu2 %v2908_v30 }
 0x29b   :  { %v1103_v34 = vpop.f32.mrf.mxu3 }
 0x29c   :  { %v946_v5 = vpop.f32.mrf.mxu2  ;;  %v2997_v6 = vadd.f32 %v1103_v34, %v939_v14 }
 0x29d   :  { %v947_v4 = vadd.f32 %v946_v5, %v2888_v27 }
 0x2a0   :  { %1590 = vmatmul.f32.gmra.mxu3 %v2908_v30 }
 0x2a3   :  { %v1107_v60 = vpop.f32.mrf.mxu3 }
 0x2a4   :  { %v3001_v49 = vadd.f32 %v1107_v60, %v947_v4  ;;  %v1434_v3 = vpop.f32.mrf.mxu2 }
 0x2a5   :  { %v1435_v18 = vadd.f32 %v1434_v3, %v2932_v51 }
 0x2ab   :  { %v1531_v36 = vpop.f32.mrf.mxu3 }
 0x2ac   :  { %v1438_v47 = vpop.f32.mrf.mxu2  ;;  %v3004_v41 = vadd.f32 %v1531_v36, %v1435_v18 }
 0x2ad   :  { %v1439_v56 = vadd.f32 %v1438_v47, %v2936_v19 }
 0x2b3   :  { %v1535_v24 = vpop.f32.mrf.mxu3 }
 0x2b4   :  { %v1442_v15 = vpop.f32.mrf.mxu2  ;;  %v3007_v39 = vadd.f32 %v1535_v24, %v1439_v56 }
 0x2b5   :  { %v1443_v27 = vadd.f32 %v1442_v15, %v2940_v63 }
 0x2bb   :  { %v1539_v10 = vpop.f32.mrf.mxu3 }
 0x2bc   :  { %v1446_v30 = vpop.f32.mrf.mxu2  ;;  %v3010_v1 = vadd.f32 %v1539_v10, %v1443_v27  ;;  %v1212_v10 = vadd.f32 %v1211_v57, %v2977_v45 }
 0x2bd   :  { %v1447_v26 = vadd.f32 %v1446_v30, %v2944_v40 }
 0x2c3   :  { %v1543_v44 = vpop.f32.mrf.mxu3 }
 0x2c4   :  { %v1450_v51 = vpop.f32.mrf.mxu2  ;;  %v3013_v16 = vadd.f32 %v1543_v44, %v1447_v26 }
 0x2c5   :  { %v1451_v42 = vadd.f32 %v1450_v51, %v2948_v21  ;;  %v1329_v21 = vpop.f32.mrf.mxu1 }
 0x2cb   :  { %v1547_v52 = vpop.f32.mrf.mxu3 }
 0x2cc   :  { %v1454_v19 = vpop.f32.mrf.mxu2  ;;  %v3016_v13 = vadd.f32 %v1547_v52, %v1451_v42  ;;  %v1207_v42 = vadd.f32 %v1206_v11, %v2972_v59 }
 0x2cd   :  { %v1455_v53 = vadd.f32 %v1454_v19, %v2953_v9  ;;  %v1335_v46 = vpop.f32.mrf.mxu1 }
 0x2d3   :  { %v1551_v29 = vpop.f32.mrf.mxu3 }
 0x2d4   :  { %v1458_v63 = vpop.f32.mrf.mxu2  ;;  %v3019_v31 = vadd.f32 %v1551_v29, %v1455_v53 }
 0x2d5   :  { %v1459_v28 = vadd.f32 %v1458_v63, %v2958_v38  ;;  %v1216_v38 = vpop.f32.mrf.mxu0  ;;  %v1341_v12 = vpop.f32.mrf.mxu1 }
 0x2d6   :  { %v1217_v24 = vadd.f32 %v1216_v38, %v2982_v32 }
 0x2d8   :  { %v1342_v52 = vadd.f32 %v1341_v12, %v1217_v24 }
 0x2db   :  { %v1555_v54 = vpop.f32.mrf.mxu3 }
 0x2dc   :  { %v1462_v40 = vpop.f32.mrf.mxu2  ;;  %v3022_v61 = vadd.f32 %v1555_v54, %v1459_v28 }
 0x2dd   :  { %v1463_v55 = vadd.f32 %v1462_v40, %v2963_v8  ;;  %v1221_v33 = vpop.f32.mrf.mxu0  ;;  %v1347_v8 = vpop.f32.mrf.mxu1  ;;  %v1330_v40 = vadd.f32 %v1329_v21, %v1207_v42 }
 0x2de   :  { %v1222_v56 = vadd.f32 %v1221_v33, %v2987_v20  ;;  %v1336_v20 = vadd.f32 %v1335_v46, %v1212_v10 }
 0x2e0   :  { %v1348_v26 = vadd.f32 %v1347_v8, %v1222_v56 }
 0x2e3   :  { %v1559_v37 = vpop.f32.mrf.mxu3 }
 0x2e4   :  { %v1466_v62 = vpop.f32.mrf.mxu2  ;;  %v3025_v35 = vadd.f32 %v1559_v37, %v1463_v55 }
 0x2e5   :  { %v1467_v9 = vadd.f32 %v1466_v62, %v2968_v25  ;;  %v1226_v14 = vpop.f32.mrf.mxu0  ;;  %v1353_v34 = vpop.f32.mrf.mxu1 }
 0x2e6   :  { %v1227_v18 = vadd.f32 %v1226_v14, %v2992_v17 }
 0x2e8   :  { %v1354_v15 = vadd.f32 %v1353_v34, %v1227_v18 }
 0x2eb   :  { %v1563_v43 = vpop.f32.mrf.mxu3 }
 0x2ec   :  { %v1470_v0 = vpop.f32.mrf.mxu2  ;;  %v1564_v48 = vadd.f32 %v1563_v43, %v1467_v9 }
 0x2ed   :  { %v1231_v25 = vpop.f32.mrf.mxu0  ;;  %v1359_v60 = vpop.f32.mrf.mxu1  ;;  %v1471_v59 = vadd.f32 %v1470_v0, %v1330_v40 }
 0x2ee   :  { %v1232_v36 = vadd.f32 %v1231_v25, %v2997_v6 }
 0x2f0   :  { %v1360_v27 = vadd.f32 %v1359_v60, %v1232_v36 }
 0x2f3   :  { %v1567_v2 = vpop.f32.mrf.mxu3 }
 0x2f4   :  { %v1474_v22 = vpop.f32.mrf.mxu2  ;;  %v1568_v57 = vadd.f32 %v1567_v2, %v1471_v59 }
 0x2f5   :  { %v1236_v30 = vpop.f32.mrf.mxu0  ;;  %v1365_v63 = vpop.f32.mrf.mxu1  ;;  %v1475_v54 = vadd.f32 %v1474_v22, %v1336_v20 }
 0x2f6   :  { %v1237_v17 = vadd.f32 %v1236_v30, %v3001_v49 }
 0x2f8   :  { %v1366_v55 = vadd.f32 %v1365_v63, %v1237_v17 }
 0x2fb   :  { %v1571_v7 = vpop.f32.mrf.mxu3 }
 0x2fc   :  { %v1478_v50 = vpop.f32.mrf.mxu2  ;;  %v1572_v62 = vadd.f32 %v1571_v7, %v1475_v54 }
 0x2fd   :  { %v1479_v32 = vadd.f32 %v1478_v50, %v1342_v52 }
 0x303   :  { %v1575_v23 = vpop.f32.mrf.mxu3 }
 0x304   :  { %v1482_v58 = vpop.f32.mrf.mxu2  ;;  %v1576_v37 = vadd.f32 %v1575_v23, %v1479_v32 }
 0x305   :  { %v1483_v6 = vadd.f32 %v1482_v58, %v1348_v26 }
 0x30b   :  { %v1579_v5 = vpop.f32.mrf.mxu3 }
 0x30c   :  { %v1486_v4 = vpop.f32.mrf.mxu2  ;;  %v1580_v28 = vadd.f32 %v1579_v5, %v1483_v6 }
 0x30d   :  { %v1487_v44 = vadd.f32 %v1486_v4, %v1354_v15 }
 0x313   :  { %v1583_v3 = vpop.f32.mrf.mxu3 }
 0x314   :  { %v1490_v47 = vpop.f32.mrf.mxu2  ;;  %v1584_v53 = vadd.f32 %v1583_v3, %v1487_v44 }
 0x315   :  { %v1491_v51 = vadd.f32 %v1490_v47, %v1360_v27 }
 0x31b   :  { %v1587_v19 = vpop.f32.mrf.mxu3 }
 0x31c   :  { %v1588_v29 = vadd.f32 %v1587_v19, %v1491_v51  ;;  %v1494_v45 = vpop.f32.mrf.mxu2 }
 0x31d   :  { %v1495_v11 = vadd.f32 %v1494_v45, %v1366_v55 }
 0x31e   :  { %2015 = vtanh.f32 %v1588_v29 }
 0x31f   :  { %2017 = vtanh.f32 %v1584_v53 }
 0x320   :  { %2019 = vtanh.f32 %v1580_v28 }
 0x321   :  { %2021 = vtanh.f32 %v1576_v37 }
 0x322   :  { %2023 = vtanh.f32 %v1572_v62 }
 0x323   :  { %v1591_v9 = vpop.f32.mrf.mxu3 }
 0x324   :  { %v2016_v49 = vpop.eup %2015  ;;  %v1592_v43 = vadd.f32 %v1591_v9, %v1495_v11 }
 0x325   :  { %v2018_v46 = vpop.eup %2017  ;;  %v3035_v38 = vand.u32 4294901760, %v2016_v49 }
 0x326   :  { %2025 = vtanh.f32 %v1592_v43  ;;  %v2020_v22 = vpop.eup %2019  ;;  %v3037_v21 = vand.u32 4294901760, %v2018_v46 }
 0x327   :  { %2027 = vtanh.f32 %v1568_v57  ;;  %v2022_v12 = vpop.eup %2021  ;;  %v3041_v0 = vsub.f32 %v2016_v49, %v3035_v38  ;;  %v3043_v2 = vand.u32 4294901760, %v2020_v22 }
 0x328   :  { %2029 = vtanh.f32 %v1564_v48  ;;  %v2024_v33 = vpop.eup %2023  ;;  %v3049_v8 = vsub.f32 %v2018_v46, %v3037_v21  ;;  %v3051_v48 = vand.u32 4294901760, %v2022_v12 }
 0x329   :  { %2031 = vtanh.f32 %v3025_v35  ;;  %v3062_v14 = vand.u32 4294901760, %v2024_v33  ;;  %v1664_v34 = vand.u32 4294901760, %v3041_v0 }
 0x32a   :  { %2033 = vtanh.f32 %v3022_v61  ;;  %v3060_v61 = vsub.f32 %v2020_v22, %v3043_v2  ;;  %v3070_v4 = vsub.f32 %v2022_v12, %v3051_v48  ;;  %v1670_v60 = vand.u32 4294901760, %v3049_v8 }
 0x32b   :  { %2035 = vtanh.f32 %v3019_v31  ;;  %v1665_v36 = vsub.f32 %v3041_v0, %v1664_v34  ;;  %v3088_v47 = vsub.f32 %v2024_v33, %v3062_v14 }
 0x32c   :  { %v2026_v7 = vpop.eup %2025  ;;  %2037 = vtanh.f32 %v3016_v13  ;;  %v1671_v27 = vsub.f32 %v3049_v8, %v1670_v60  ;;  %v1682_v30 = vand.u32 4294901760, %v3070_v4 }
 0x32d   :  { %v3046_v50 = vand.u32 4294901760, %v2026_v7  ;;  %v2028_v23 = vpop.eup %2027  ;;  %2039 = vtanh.f32 %v3013_v16  ;;  %v1676_v16 = vand.u32 4294901760, %v3060_v61  ;;  %v1666_v44 = vand.u32 4294901760, %v1665_v36 }
 0x32e   :  { %v2030_v58 = vpop.eup %2029  ;;  %v3072_v25 = vand.u32 4294901760, %v2028_v23  ;;  %2041 = vtanh.f32 %v3010_v1  ;;  %v1688_v52 = vand.u32 4294901760, %v3088_v47  ;;  %v1672_v17 = vand.u32 4294901760, %v1671_v27 }
 0x32f   :  { %1616 = vmatpush.msrb.mxu0 %v3046_v50  ;;  %1812 = vmatpush.msra.mxu3 %v3046_v50  ;;  %v3057_v35 = vsub.f32 %v2026_v7, %v3046_v50  ;;  %v2032_v5 = vpop.eup %2031  ;;  %v3077_v3 = vand.u32 4294901760, %v2030_v58  ;;  %2043 = vtanh.f32 %v3007_v39  ;;  %v1677_v51 = vsub.f32 %v3060_v61, %v1676_v16 }
 0x330   :  { %v2034_v13 = vpop.eup %2033  ;;  %v3093_v24 = vand.u32 4294901760, %v2032_v5  ;;  %v3101_v10 = vsub.f32 %v2028_v23, %v3072_v25  ;;  %2045 = vtanh.f32 %v3004_v41  ;;  %v1683_v6 = vsub.f32 %v3070_v4, %v1682_v30 }
 0x331   :  { %1618 = vmatpush.msrb.mxu0 %v3035_v38  ;;  %1759 = vmatpush.msra.mxu2 %v3057_v35  ;;  %v1658_v31 = vand.u32 4294901760, %v3057_v35  ;;  %v2036_v56 = vpop.eup %2035  ;;  %v3106_v1 = vand.u32 4294901760, %v2034_v13  ;;  %v3113_v42 = vsub.f32 %v2030_v58, %v3077_v3  ;;  %v1678_v63 = vand.u32 4294901760, %v1677_v51 }
 0x332   :  { %1814 = vmatpush.msra.mxu3 %v3035_v38  ;;  %v2038_v26 = vpop.eup %2037  ;;  %v3119_v39 = vand.u32 4294901760, %v2036_v56  ;;  %v3126_v53 = vsub.f32 %v2032_v5, %v3093_v24  ;;  %v1694_v29 = vand.u32 4294901760, %v3101_v10  ;;  %v1689_v32 = vsub.f32 %v3088_v47, %v1688_v52 }
 0x333   :  { %1620 = vmatpush.msrb.mxu0 %v3037_v21  ;;  %1762 = vmatpush.msra.mxu2 %v3041_v0  ;;  %v1659_v18 = vsub.f32 %v3057_v35, %v1658_v31  ;;  %v2040_v19 = vpop.eup %2039  ;;  %v3131_v20 = vand.u32 4294901760, %v2038_v26  ;;  %v3138_v28 = vsub.f32 %v2034_v13, %v3106_v1  ;;  %v1700_v54 = vand.u32 4294901760, %v3113_v42  ;;  %v1610_v13 = vld [vmem:[%s3292_s2 + $0x80] sm:$0xff] }
 0x334   :  { %1816 = vmatpush.msra.mxu3 %v3037_v21  ;;  %v2042_v41 = vpop.eup %2041  ;;  %v3143_v40 = vand.u32 4294901760, %v2040_v19  ;;  %v1684_v55 = vand.u32 4294901760, %v1683_v6  ;;  %v1695_v37 = vsub.f32 %v3101_v10, %v1694_v29  ;;  %v3150_v62 = vsub.f32 %v2036_v56, %v3119_v39  ;;  %v2053_v0 = vld [vmem:[%s3291_s1] sm:$0xff]  ;;  %s2082_s1 = smov [#allocation2]  }
 0x335   :  { %1622 = vmatpush.msrb.mxu0 %v3043_v2  ;;  %1765 = vmatpush.msra.mxu2 %v3049_v8  ;;  %v1660_v15 = vand.u32 4294901760, %v1659_v18  ;;  %v2044_v45 = vpop.eup %2043  ;;  %v1706_v59 = vand.u32 4294901760, %v3126_v53  ;;  %v3155_v9 = vand.u32 4294901760, %v2042_v41  ;;  %v1690_v49 = vand.u32 4294901760, %v1689_v32  ;;  %s1962_s9 = sshll.u32 %s2082_s1, 4  ;;  %s1963_s9 = int_to_ptr.vmem [resolvable:$true] %s1962_s9 }
 0x336   :  { %1818 = vmatpush.msra.mxu3 %v3043_v2  ;;  %v2046_v11 = vpop.eup %2045  ;;  %v1701_v57 = vsub.f32 %v3113_v42, %v1700_v54  ;;  %v3162_v43 = vsub.f32 %v2038_v26, %v3131_v20  ;;  %v1712_v46 = vand.u32 4294901760, %v3138_v28  ;;  %v3167_v22 = vand.u32 4294901760, %v2044_v45 }
 0x337   :  { %1624 = vmatpush.msrb.mxu0 %v3051_v48  ;;  %1661 = vmatpush.msrb.mxu1 %v1660_v15  ;;  %v1696_v12 = vand.u32 4294901760, %v1695_v37  ;;  %v1707_v33 = vsub.f32 %v3126_v53, %v1706_v59  ;;  %v3174_v7 = vsub.f32 %v2040_v19, %v3143_v40  ;;  %v1718_v23 = vand.u32 4294901760, %v3150_v62 }
 0x338   :  { %1768 = vmatpush.msra.mxu2 %v3060_v61  ;;  %1820 = vmatpush.msra.mxu3 %v3051_v48  ;;  %v3180_v58 = vsub.f32 %v2042_v41, %v3155_v9  ;;  %v3182_v5 = vand.u32 4294901760, %v2046_v11  ;;  %v1702_v18 = vand.u32 4294901760, %v1701_v57  ;;  %v1713_v36 = vsub.f32 %v3138_v28, %v1712_v46 }
 0x339   :  { %1626 = vmatpush.msrb.mxu0 %v3062_v14  ;;  %1667 = vmatpush.msrb.mxu1 %v1666_v44  ;;  %v1724_v56 = vand.u32 4294901760, %v3162_v43  ;;  %v3192_v15 = vand.u32 4294901760, %v1610_v13  ;;  %v3197_v27 = vsub.f32 %v2044_v45, %v3167_v22  ;;  %v1708_v26 = vand.u32 4294901760, %v1707_v33 }
 0x33a   :  { %1771 = vmatpush.msra.mxu2 %v3070_v4  ;;  %1822 = vmatpush.msra.mxu3 %v3062_v14  ;;  %v1719_v44 = vsub.f32 %v3150_v62, %v1718_v23  ;;  %v1730_v51 = vand.u32 4294901760, %v3174_v7  ;;  %v1714_v6 = vand.u32 4294901760, %v1713_v36 }
 0x33b   :  { %1628 = vmatpush.msrb.mxu0 %v3072_v25  ;;  %1673 = vmatpush.msrb.mxu1 %v1672_v17  ;;  %v1648_v19 = vsub.f32 %v1610_v13, %v3192_v15  ;;  %v3208_v17 = vsub.f32 %v2046_v11, %v3182_v5  ;;  %v1725_v41 = vsub.f32 %v3162_v43, %v1724_v56  ;;  %v1742_v37 = vand.u32 4294901760, %v3197_v27 }
 0x33c   :  { %1774 = vmatpush.msra.mxu2 %v3088_v47  ;;  %1824 = vmatpush.msra.mxu3 %v3072_v25  ;;  %v1720_v45 = vand.u32 4294901760, %v1719_v44 }
 0x33d   :  { %1630 = vmatpush.msrb.mxu0 %v3077_v3  ;;  %1679 = vmatpush.msrb.mxu1 %v1678_v63  ;;  %v1736_v63 = vand.u32 4294901760, %v3180_v58  ;;  %v1649_v32 = vand.u32 4294901760, %v1648_v19 }
 0x33e   :  { %1777 = vmatpush.msra.mxu2 %v3101_v10  ;;  %1826 = vmatpush.msra.mxu3 %v3077_v3 }
 0x33f   :  { %1632 = vmatpush.msrb.mxu0 %v3093_v24  ;;  %1685 = vmatpush.msrb.mxu1 %v1684_v55  ;;  %v1731_v55 = vsub.f32 %v3174_v7, %v1730_v51  ;;  %v1650_v11 = vsub.f32 %v1648_v19, %v1649_v32  ;;  %v1737_v57 = vsub.f32 %v3180_v58, %v1736_v63 }
 0x340   :  { %1780 = vmatpush.msra.mxu2 %v3113_v42  ;;  %1828 = vmatpush.msra.mxu3 %v3093_v24 }
 0x341   :  { %1634 = vmatpush.msrb.mxu0 %v3106_v1  ;;  %1691 = vmatpush.msrb.mxu1 %v1690_v49  ;;  %v1726_v49 = vand.u32 4294901760, %v1725_v41  ;;  %v1651_v33 = vand.u32 4294901760, %v1650_v11  ;;  %v1732_v13 = vand.u32 4294901760, %v1731_v55  ;;  %v1738_v36 = vand.u32 4294901760, %v1737_v57 }
 0x342   :  { %1783 = vmatpush.msra.mxu2 %v3126_v53  ;;  %1830 = vmatpush.msra.mxu3 %v3106_v1 }
 0x343   :  { %1636 = vmatpush.msrb.mxu0 %v3119_v39  ;;  %1697 = vmatpush.msrb.mxu1 %v1696_v12  ;;  %v1748_v12 = vand.u32 4294901760, %v3208_v17 }
 0x344   :  { %1786 = vmatpush.msra.mxu2 %v3138_v28  ;;  %1832 = vmatpush.msra.mxu3 %v3119_v39 }
 0x345   :  { %1638 = vmatpush.msrb.mxu0 %v3131_v20  ;;  %1703 = vmatpush.msrb.mxu1 %v1702_v18  ;;  %v1743_v18 = vsub.f32 %v3197_v27, %v1742_v37 }
 0x346   :  { %1789 = vmatpush.msra.mxu2 %v3150_v62  ;;  %1834 = vmatpush.msra.mxu3 %v3131_v20 }
 0x347   :  { %1640 = vmatpush.msrb.mxu0 %v3143_v40  ;;  %1709 = vmatpush.msrb.mxu1 %v1708_v26  ;;  %v1749_v26 = vsub.f32 %v3208_v17, %v1748_v12  ;;  %v1744_v44 = vand.u32 4294901760, %v1743_v18 }
 0x348   :  { %1792 = vmatpush.msra.mxu2 %v3162_v43  ;;  %1836 = vmatpush.msra.mxu3 %v3143_v40 }
 0x349   :  { %1642 = vmatpush.msrb.mxu0 %v3155_v9  ;;  %1715 = vmatpush.msrb.mxu1 %v1714_v6  ;;  %v1750_v35 = vand.u32 4294901760, %v1749_v26 }
 0x34a   :  { %1795 = vmatpush.msra.mxu2 %v3174_v7  ;;  %1838 = vmatpush.msra.mxu3 %v3155_v9 }
 0x34b   :  { %1644 = vmatpush.msrb.mxu0 %v3167_v22  ;;  %1721 = vmatpush.msrb.mxu1 %v1720_v45 }
 0x34c   :  { %1798 = vmatpush.msra.mxu2 %v3180_v58  ;;  %1840 = vmatpush.msra.mxu3 %v3167_v22 }
 0x34d   :  { %1646 = vmatpush.msrb.mxu0 %v3182_v5  ;;  %1727 = vmatpush.msrb.mxu1 %v1726_v49 }
 0x34e   :  { %1801 = vmatpush.msra.mxu2 %v3197_v27  ;;  %1842 = vmatpush.msra.mxu3 %v3182_v5 }
 0x34f   :  { %1853 = vmatpush.msra.mxu0 %v1658_v31  ;;  %1733 = vmatpush.msrb.mxu1 %v1732_v13  ;;  %v2081_v31 = vmov 6  }
 0x350   :  { %1804 = vmatpush.msra.mxu2 %v3208_v17  ;;  %1652 = vmatmul.f32.vlgmr.msrb.gmra.mxu0 %v1651_v33 }
 0x351   :  { %1857 = vmatpush.msra.mxu0 %v1664_v34  ;;  %1739 = vmatpush.msrb.mxu1 %v1738_v36 }
 0x352   :  { %1807 = vmatmul.f32.vlgmr.msra.gmra.mxu2 %v1648_v19  ;;  %1846 = vmatmul.f32.vlgmr.msra.gmra.mxu3 %v1649_v32 }
 0x353   :  { %1861 = vmatpush.msra.mxu0 %v1670_v60  ;;  %1745 = vmatpush.msrb.mxu1 %v1744_v44 }
 0x354   :  { %1981 = vset.pattern.permute.xlu1 %v2081_v31  ;;  %1982 = vset.pattern.permute.xlu0 %v2081_v31 }
 0x355   :  { %1865 = vmatpush.msra.mxu0 %v1676_v16  ;;  %1751 = vmatpush.msrb.mxu1 %v1750_v35 }
 0x356   :  { %1753 = vmatmul.f32.vlgmr.msrb.gmra.mxu1 %v3192_v15  ;;  %1612 = vperm.xlu1 %1981, %v2053_v0  }
 0x357   :  { %1920 = vmatpush.msra.mxu1 %v3046_v50  ;;  %1869 = vmatpush.msra.mxu0 %v1682_v30 }
 0x359   :  { %1922 = vmatpush.msra.mxu1 %v3035_v38  ;;  %1873 = vmatpush.msra.mxu0 %v1688_v52 }
 0x35b   :  { %1924 = vmatpush.msra.mxu1 %v3037_v21  ;;  %1877 = vmatpush.msra.mxu0 %v1694_v29 }
 0x35d   :  { %1926 = vmatpush.msra.mxu1 %v3043_v2  ;;  %1881 = vmatpush.msra.mxu0 %v1700_v54 }
 0x35f   :  { %1928 = vmatpush.msra.mxu1 %v3051_v48  ;;  %1885 = vmatpush.msra.mxu0 %v1706_v59 }
 0x361   :  { %1930 = vmatpush.msra.mxu1 %v3062_v14  ;;  %1889 = vmatpush.msra.mxu0 %v1712_v46 }
 0x363   :  { %1932 = vmatpush.msra.mxu1 %v3072_v25  ;;  %1893 = vmatpush.msra.mxu0 %v1718_v23 }
 0x365   :  { %1934 = vmatpush.msra.mxu1 %v3077_v3  ;;  %1897 = vmatpush.msra.mxu0 %v1724_v56 }
 0x367   :  { %1936 = vmatpush.msra.mxu1 %v3093_v24  ;;  %1901 = vmatpush.msra.mxu0 %v1730_v51 }
 0x369   :  { %1938 = vmatpush.msra.mxu1 %v3106_v1  ;;  %1905 = vmatpush.msra.mxu0 %v1736_v63 }
 0x36b   :  { %1940 = vmatpush.msra.mxu1 %v3119_v39  ;;  %1909 = vmatpush.msra.mxu0 %v1742_v37 }
 0x36d   :  { %1942 = vmatpush.msra.mxu1 %v3131_v20  ;;  %1913 = vmatpush.msra.mxu0 %v1748_v12 }
 0x36e   :  { %1915 = vmatmul.f32.vlgmr.msra.gmra.mxu0 %v3192_v15 }
 0x36f   :  { %1944 = vmatpush.msra.mxu1 %v3143_v40 }
 0x371   :  { %1946 = vmatpush.msra.mxu1 %v3155_v9 }
 0x373   :  { %1948 = vmatpush.msra.mxu1 %v3167_v22 }
 0x375   :  { %1950 = vmatpush.msra.mxu1 %v3182_v5 }
 0x376   :  { %1952 = vmatmul.f32.vlgmr.msra.gmra.mxu1 %v3192_v15 }
 0x3c8   :  { %v1613_v38 = vpop.permute.xlu1 %1612 }
 0x3cd   :  { %v1653_v21 = vpop.f32.mrf.mxu0 }
 0x3ce   :  { %v1654_v2 = vadd.f32 %v1653_v21, %v1613_v38 }
 0x3d3   :  { %v1754_v50 = vpop.f32.mrf.mxu1 }
 0x3d4   :  { %v1755_v8 = vadd.f32 %v1754_v50, %v1654_v2 }
 0x3d5   :  { %v1808_v48 = vpop.f32.mrf.mxu2  ;;  %v1847_v14 = vpop.f32.mrf.mxu3 }
 0x3d6   :  { %v1809_v61 = vadd.f32 %v1808_v48, %v1755_v8 }
 0x3d8   :  { %v1848_v34 = vadd.f32 %v1847_v14, %v1809_v61 }
 0x3eb   :  { %v1916_v4 = vpop.f32.mrf.mxu0 }
 0x3ec   :  { %v1917_v25 = vadd.f32 %v1916_v4, %v1848_v34 }
 0x3f3   :  { %v1953_v60 = vpop.f32.mrf.mxu1 }
 0x3f4   :  { %v1954_v3 = vadd.f32 %v1953_v60, %v1917_v25 }
 0x3f6   :  { %1956 = vst [vmem:[#allocation2] sm:$0xff] %v1954_v3 }
 0x3f7   :  { %1967 = dma.vmem_to_hbm [thread:$0]  %s1963_s9, 128, %s1965_s12, [#allocation3]  }
 0x3f8   :  { %2078 = dma.done.wait [#allocation3], 128  }
 0x3f9   :  { %2079 = vsyncadd [#allocation3], 4294967168 }
 0x3fa   :  { %1972 = vsyncpa [#allocation3], 1 }

</bundles_post_ra>
